<compile_context>
chip_gen: v7x
topology: tpu7x:2x2x1
jax: 0.10.0
libtpu: 0.0.40
codegen_flags: <defaults>
</compile_context>

<pallas_src>
import functools

import jax
import jax.numpy as jnp
from jax.experimental import pallas as pl
from jax.experimental.pallas import tpu as pltpu


def _conv_bn_silu_kernel(x_ref, w_ref, b_ref, o_ref, *, KH, KW, stride, TH, Wo, tile):
    # x_ref: (1, 1, 1, band_h, Wp, Cin_g)  row band of the padded NHWC slab (compute dtype)
    # w_ref: (1, Cout_g, KH*KW*Cin_g)      BN-scale-folded, tap-packed weights
    # b_ref: (1, Cout_g, 1)                folded BN bias (f32)
    # o_ref: (1, 1, Cout_g, tile_pad)      channel-major output tile
    cin_g = x_ref.shape[-1]

    # In-kernel im2col: KH*KW addressed ref loads (offsets folded into vld, no shifted
    # band copies), packed along the contraction axis so ONE dot feeds the MXU with
    # K = KH*KW*Cin_g instead of KH*KW dots with K = Cin_g.
    taps = []
    for kh in range(KH):
        hs = pl.ds(kh, TH) if stride == 1 else pl.ds(kh, TH, stride=stride)
        for kw in range(KW):
            ws = pl.ds(kw, Wo) if stride == 1 else pl.ds(kw, Wo, stride=stride)
            t = x_ref[0, 0, 0, hs, ws, :]                  # (TH, Wo, Cin_g)
            taps.append(t.reshape(TH * Wo, cin_g))
    xs = taps[0] if len(taps) == 1 else jnp.concatenate(taps, axis=-1)

    # (Cout_g, K) x (TH*Wo, K)^T -> (Cout_g, TH*Wo): f32 accumulation on the MXU.
    acc = jax.lax.dot_general(w_ref[0], xs, (((1,), (1,)), ((), ())),
                              preferred_element_type=jnp.float32)
    y = acc + b_ref[0]                                     # BN (scale folded into w)
    y = y * jax.nn.sigmoid(y)                              # SiLU: single EUP push
    y = y.astype(o_ref.dtype)
    if tile == o_ref.shape[-1]:
        o_ref[0, 0] = y                                    # lane-dense unmasked store
    else:
        # Rare ragged case (TH*Wo not a multiple of 128): padded tail left untouched,
        # sliced off in the wrapper.
        o_ref[0, 0, :, :tile] = y


def _pick_row_tile(Ho, Wo, Cout_g):
    """Pick the output row-tile TH (Cout_g- and lane-aware).

    TH*Wo is capped so the f32 accumulator (Cout_g x TH*Wo x 4B) stays ~<=128 KiB
    (register/VMEM friendly, no spills) and preferentially chosen so TH*Wo is a
    multiple of 128 (unmasked stores). Falls back to padding the flat tile to 128.
    """
    budget = max(128, min(4096, (128 * 1024 // 4) // max(Cout_g, 1)))
    th = 1 if Wo > budget else max(1, min(Ho, budget // Wo))
    for cand in range(th, 0, -1):
        if (cand * Wo) % 128 == 0:
            th = cand
            break
    n_tiles = -(-Ho // th)
    tile = th * Wo
    tile_pad = -(-tile // 128) * 128
    return th, n_tiles, tile, tile_pad


def _vmem_limit_bytes():
    # 128 MiB physical on v5e/v6e -> ~110 MiB limit; 64 MiB on v7x -> ~56 MiB.
    cap = 64 * 1024 * 1024
    try:
        cap = int(pltpu.get_tpu_info().vmem_capacity_bytes)
    except Exception:
        pass
    return int(max(32 * 1024 * 1024, min(cap - 8 * 1024 * 1024, 110 * 1024 * 1024)))


def conv_block(x_nchw, weight, gamma, beta, running_mean, running_var,
               *, stride, padding, groups=1, eps=1e-5,
               compute_dtype=jnp.bfloat16, out_dtype=None):
    """Fused Conv2d(bias=False) + BatchNorm2d(eval) + SiLU.

    x_nchw: (N, Cin, H, W), weight: (Cout, Cin//groups, KH, KW). Returns NCHW.
    """
    N, Cin, H, W = x_nchw.shape
    Cout, Cin_g, KH, KW = weight.shape
    G = groups
    assert Cin == Cin_g * G and Cout % G == 0
    Cout_g = Cout // G
    out_dtype = x_nchw.dtype if out_dtype is None else out_dtype

    Hp, Wp = H + 2 * padding, W + 2 * padding
    Ho = (Hp - KH) // stride + 1
    Wo = (Wp - KW) // stride + 1

    TH, n_tiles, tile, tile_pad = _pick_row_tile(Ho, Wo, Cout_g)
    band_h = (TH - 1) * stride + KH                        # input rows one tile needs

    # ---- activations: NCHW -> grouped, padded NHWC row bands (one fused XLA pass) --
    x = x_nchw.reshape(N, G, Cin_g, H, W)
    x = jnp.transpose(x, (0, 1, 3, 4, 2))                  # (N, G, H, W, Cin_g)
    x = jnp.pad(x, ((0, 0), (0, 0), (padding, padding), (padding, padding), (0, 0)))
    starts = jnp.arange(n_tiles, dtype=jnp.int32) * (TH * stride)
    rows = jnp.minimum(
        starts[:, None] + jnp.arange(band_h, dtype=jnp.int32)[None, :], Hp - 1)
    x = x[:, :, rows]                                      # (N, G, n_tiles, band_h, Wp, Cin_g)
    x = x.astype(compute_dtype)
    # TODO(synk): for Cin_g << 128 (stem / grouped convs) pack several groups or batch
    # items onto the 128-lane axis and fuse this relayout into the producing layer to
    # lift lane utilization and remove one HBM round trip over the activations.

    # ---- weights: fold BN (eval) into scale/bias, tap-pack the contraction axis ----
    inv_std = jax.lax.rsqrt(running_var.astype(jnp.float32) + eps)
    scale = gamma.astype(jnp.float32) * inv_std                       # (Cout,)
    bias = (beta.astype(jnp.float32) - running_mean.astype(jnp.float32) * scale)
    bias = bias.reshape(G, Cout_g, 1)
    w = weight.astype(jnp.float32) * scale[:, None, None, None]
    w = w.reshape(G, Cout_g, Cin_g, KH, KW)
    w = jnp.transpose(w, (0, 1, 3, 4, 2))                  # (G, Cout_g, KH, KW, Cin_g)
    w = w.reshape(G, Cout_g, KH * KW * Cin_g).astype(compute_dtype)

    kernel = functools.partial(_conv_bn_silu_kernel, KH=KH, KW=KW, stride=stride,
                               TH=TH, Wo=Wo, tile=tile)
    out = pl.pallas_call(
        kernel,
        out_shape=jax.ShapeDtypeStruct((N, G, Cout_g, n_tiles * tile_pad), out_dtype),
        grid=(G, N, n_tiles),        # weights fetched once per group, not once per batch
        in_specs=[
            pl.BlockSpec((1, 1, 1, band_h, Wp, Cin_g),
                         lambda g, n, i: (n, g, i, 0, 0, 0)),
            pl.BlockSpec((1, Cout_g, KH * KW * Cin_g), lambda g, n, i: (g, 0, 0)),
            pl.BlockSpec((1, Cout_g, 1), lambda g, n, i: (g, 0, 0)),
        ],
        out_specs=pl.BlockSpec((1, 1, Cout_g, tile_pad), lambda g, n, i: (n, g, 0, i)),
        compiler_params=pltpu.CompilerParams(
            dimension_semantics=("parallel", "parallel", "arbitrary"),
            vmem_limit_bytes=_vmem_limit_bytes()),
    )(x, w, bias)

    # (N, G, Cout_g, n_tiles*tile_pad) -> (N, Cout, Ho, Wo): slice pad, metadata reshape.
    out = out.reshape(N, G, Cout_g, n_tiles, tile_pad)[..., :tile]
    out = out.reshape(N, G, Cout_g, n_tiles * TH, Wo)[:, :, :, :Ho, :]
    return out.reshape(N, Cout, Ho, Wo)


def _reference(x, weight, gamma, beta, mean, var, *, stride, padding, groups, eps=1e-5):
    y = jax.lax.conv_general_dilated(
        x, weight, window_strides=(stride, stride),
        padding=[(padding, padding), (padding, padding)],
        dimension_numbers=("NCHW", "OIHW", "NCHW"),
        feature_group_count=groups)
    s = (gamma / jnp.sqrt(var + eps))[None, :, None, None]
    b = (beta - mean * gamma / jnp.sqrt(var + eps))[None, :, None, None]
    y = y * s + b
    return y * jax.nn.sigmoid(y)


if __name__ == "__main__":
    # ConvBlock(in_channels=4, out_channels=8, kernel_size=3, stride=1, padding=1)
    N, Cin, H, W = 2, 4, 16, 16
    Cout, KH, KW, stride, padding, groups = 8, 3, 3, 1, 1, 1

    key = jax.random.PRNGKey(0)
    kx, kw = jax.random.split(key)
    x = jax.random.normal(kx, (N, Cin, H, W), dtype=jnp.float32)
    weight = jax.random.normal(kw, (Cout, Cin // groups, KH, KW), dtype=jnp.float32) * 0.1

    # Deterministic, non-trivial BN parameters.
    gamma = jnp.linspace(0.5, 1.5, Cout, dtype=jnp.float32)
    beta = jnp.linspace(-0.2, 0.2, Cout, dtype=jnp.float32)
    running_mean = jnp.linspace(-0.1, 0.1, Cout, dtype=jnp.float32)
    running_var = jnp.linspace(0.8, 1.2, Cout, dtype=jnp.float32)

    out = conv_block(x, weight, gamma, beta, running_mean, running_var,
                     stride=stride, padding=padding, groups=groups)
    out = jax.block_until_ready(out)

    ref = _reference(x, weight, gamma, beta, running_mean, running_var,
                     stride=stride, padding=padding, groups=groups)
    assert out.shape == (N, Cout, H, W)
    # bf16 MXU operands (f32 accumulation) -> slightly looser tolerance.
    assert jnp.allclose(out, ref, atol=2e-2, rtol=2e-2), \
        f"max err {jnp.max(jnp.abs(out - ref))}"
    print("KERNEL_OK")
</pallas_src>

<mosaic_0001>
module attributes {stable_mosaic.version = 11 : i64} {
  func.func @_conv_bn_silu_kernel(%arg0: i32, %arg1: i32, %arg2: i32, %arg3: memref<1x1x1x18x18x4xbf16, #tpu.memory_space<vmem>>, %arg4: memref<1x8x36xbf16, #tpu.memory_space<vmem>>, %arg5: memref<1x8x1xf32, #tpu.memory_space<vmem>>, %arg6: memref<1x1x8x256xf32, #tpu.memory_space<vmem>>) attributes {dimension_semantics = [#tpu.dimension_semantics<parallel>, #tpu.dimension_semantics<parallel>, #tpu.dimension_semantics<arbitrary>], iteration_bounds = array<i64: 1, 2, 1>, scalar_prefetch = 0 : i64, scratch_operands = 0 : i64, tpu.core_type = #tpu.core_type<tc>, window_params = [{transform_indices = @transform_0, window_bounds = array<i64: 1, 1, 1, 18, 18, 4>}, {transform_indices = @transform_1, window_bounds = array<i64: 1, 8, 36>}, {transform_indices = @transform_2, window_bounds = array<i64: 1, 8, 1>}, {transform_indices = @transform_3, window_bounds = array<i64: 1, 1, 8, 256>}]} {
    %c0 = arith.constant 0 : index
    %c0_0 = arith.constant 0 : index
    %c0_1 = arith.constant 0 : index
    %c0_2 = arith.constant 0 : index
    %c0_3 = arith.constant 0 : index
    %c0_4 = arith.constant 0 : index
    %0 = vector.load %arg3[%c0, %c0_0, %c0_1, %c0_2, %c0_3, %c0_4] : memref<1x1x1x18x18x4xbf16, #tpu.memory_space<vmem>>, vector<1x1x1x16x16x4xbf16>
    %1 = vector.shape_cast %0 : vector<1x1x1x16x16x4xbf16> to vector<16x16x4xbf16>
    %2 = vector.shape_cast %1 : vector<16x16x4xbf16> to vector<256x4xbf16>
    %c0_5 = arith.constant 0 : index
    %c0_6 = arith.constant 0 : index
    %c0_7 = arith.constant 0 : index
    %c0_8 = arith.constant 0 : index
    %c1 = arith.constant 1 : index
    %c0_9 = arith.constant 0 : index
    %3 = vector.load %arg3[%c0_5, %c0_6, %c0_7, %c0_8, %c1, %c0_9] : memref<1x1x1x18x18x4xbf16, #tpu.memory_space<vmem>>, vector<1x1x1x16x16x4xbf16>
    %4 = vector.shape_cast %3 : vector<1x1x1x16x16x4xbf16> to vector<16x16x4xbf16>
    %5 = vector.shape_cast %4 : vector<16x16x4xbf16> to vector<256x4xbf16>
    %c0_10 = arith.constant 0 : index
    %c0_11 = arith.constant 0 : index
    %c0_12 = arith.constant 0 : index
    %c0_13 = arith.constant 0 : index
    %c2 = arith.constant 2 : index
    %c0_14 = arith.constant 0 : index
    %6 = vector.load %arg3[%c0_10, %c0_11, %c0_12, %c0_13, %c2, %c0_14] : memref<1x1x1x18x18x4xbf16, #tpu.memory_space<vmem>>, vector<1x1x1x16x16x4xbf16>
    %7 = vector.shape_cast %6 : vector<1x1x1x16x16x4xbf16> to vector<16x16x4xbf16>
    %8 = vector.shape_cast %7 : vector<16x16x4xbf16> to vector<256x4xbf16>
    %c0_15 = arith.constant 0 : index
    %c0_16 = arith.constant 0 : index
    %c0_17 = arith.constant 0 : index
    %c1_18 = arith.constant 1 : index
    %c0_19 = arith.constant 0 : index
    %c0_20 = arith.constant 0 : index
    %9 = vector.load %arg3[%c0_15, %c0_16, %c0_17, %c1_18, %c0_19, %c0_20] : memref<1x1x1x18x18x4xbf16, #tpu.memory_space<vmem>>, vector<1x1x1x16x16x4xbf16>
    %10 = vector.shape_cast %9 : vector<1x1x1x16x16x4xbf16> to vector<16x16x4xbf16>
    %11 = vector.shape_cast %10 : vector<16x16x4xbf16> to vector<256x4xbf16>
    %c0_21 = arith.constant 0 : index
    %c0_22 = arith.constant 0 : index
    %c0_23 = arith.constant 0 : index
    %c1_24 = arith.constant 1 : index
    %c1_25 = arith.constant 1 : index
    %c0_26 = arith.constant 0 : index
    %12 = vector.load %arg3[%c0_21, %c0_22, %c0_23, %c1_24, %c1_25, %c0_26] : memref<1x1x1x18x18x4xbf16, #tpu.memory_space<vmem>>, vector<1x1x1x16x16x4xbf16>
    %13 = vector.shape_cast %12 : vector<1x1x1x16x16x4xbf16> to vector<16x16x4xbf16>
    %14 = vector.shape_cast %13 : vector<16x16x4xbf16> to vector<256x4xbf16>
    %c0_27 = arith.constant 0 : index
    %c0_28 = arith.constant 0 : index
    %c0_29 = arith.constant 0 : index
    %c1_30 = arith.constant 1 : index
    %c2_31 = arith.constant 2 : index
    %c0_32 = arith.constant 0 : index
    %15 = vector.load %arg3[%c0_27, %c0_28, %c0_29, %c1_30, %c2_31, %c0_32] : memref<1x1x1x18x18x4xbf16, #tpu.memory_space<vmem>>, vector<1x1x1x16x16x4xbf16>
    %16 = vector.shape_cast %15 : vector<1x1x1x16x16x4xbf16> to vector<16x16x4xbf16>
    %17 = vector.shape_cast %16 : vector<16x16x4xbf16> to vector<256x4xbf16>
    %c0_33 = arith.constant 0 : index
    %c0_34 = arith.constant 0 : index
    %c0_35 = arith.constant 0 : index
    %c2_36 = arith.constant 2 : index
    %c0_37 = arith.constant 0 : index
    %c0_38 = arith.constant 0 : index
    %18 = vector.load %arg3[%c0_33, %c0_34, %c0_35, %c2_36, %c0_37, %c0_38] : memref<1x1x1x18x18x4xbf16, #tpu.memory_space<vmem>>, vector<1x1x1x16x16x4xbf16>
    %19 = vector.shape_cast %18 : vector<1x1x1x16x16x4xbf16> to vector<16x16x4xbf16>
    %20 = vector.shape_cast %19 : vector<16x16x4xbf16> to vector<256x4xbf16>
    %c0_39 = arith.constant 0 : index
    %c0_40 = arith.constant 0 : index
    %c0_41 = arith.constant 0 : index
    %c2_42 = arith.constant 2 : index
    %c1_43 = arith.constant 1 : index
    %c0_44 = arith.constant 0 : index
    %21 = vector.load %arg3[%c0_39, %c0_40, %c0_41, %c2_42, %c1_43, %c0_44] : memref<1x1x1x18x18x4xbf16, #tpu.memory_space<vmem>>, vector<1x1x1x16x16x4xbf16>
    %22 = vector.shape_cast %21 : vector<1x1x1x16x16x4xbf16> to vector<16x16x4xbf16>
    %23 = vector.shape_cast %22 : vector<16x16x4xbf16> to vector<256x4xbf16>
    %c0_45 = arith.constant 0 : index
    %c0_46 = arith.constant 0 : index
    %c0_47 = arith.constant 0 : index
    %c2_48 = arith.constant 2 : index
    %c2_49 = arith.constant 2 : index
    %c0_50 = arith.constant 0 : index
    %24 = vector.load %arg3[%c0_45, %c0_46, %c0_47, %c2_48, %c2_49, %c0_50] : memref<1x1x1x18x18x4xbf16, #tpu.memory_space<vmem>>, vector<1x1x1x16x16x4xbf16>
    %25 = vector.shape_cast %24 : vector<1x1x1x16x16x4xbf16> to vector<16x16x4xbf16>
    %26 = vector.shape_cast %25 : vector<16x16x4xbf16> to vector<256x4xbf16>
    %27 = tpu.concatenate %2, %5, %8, %11, %14, %17, %20, %23, %26 in 1 : vector<256x4xbf16>, vector<256x4xbf16>, vector<256x4xbf16>, vector<256x4xbf16>, vector<256x4xbf16>, vector<256x4xbf16>, vector<256x4xbf16>, vector<256x4xbf16>, vector<256x4xbf16> -> vector<256x36xbf16>
    %c0_51 = arith.constant 0 : index
    %c0_52 = arith.constant 0 : index
    %c0_53 = arith.constant 0 : index
    %28 = vector.load %arg4[%c0_51, %c0_52, %c0_53] : memref<1x8x36xbf16, #tpu.memory_space<vmem>>, vector<1x8x36xbf16>
    %29 = vector.shape_cast %28 : vector<1x8x36xbf16> to vector<8x36xbf16>
    %cst = arith.constant dense<0.000000e+00> : vector<8x256xf32>
    %30 = tpu.matmul %29, %27, %cst {dimension_numbers = #tpu.dot_dimension_numbers<[1], [1], [0], [0], [0, 0, 1, 0], [], []>} : vector<8x36xbf16>, vector<256x36xbf16>, vector<8x256xf32> -> vector<8x256xf32>
    %c0_54 = arith.constant 0 : index
    %c0_55 = arith.constant 0 : index
    %c0_56 = arith.constant 0 : index
    %31 = vector.load %arg5[%c0_54, %c0_55, %c0_56] : memref<1x8x1xf32, #tpu.memory_space<vmem>>, vector<1x8x1xf32>
    %32 = vector.shape_cast %31 : vector<1x8x1xf32> to vector<8x1xf32>
    %33 = vector.broadcast %32 : vector<8x1xf32> to vector<8x256xf32>
    %34 = arith.addf %30, %33 : vector<8x256xf32>
    %35 = arith.negf %34 : vector<8x256xf32>
    %36 = math.exp %35 : vector<8x256xf32>
    %cst_57 = arith.constant 1.000000e+00 : f32
    %37 = vector.broadcast %cst_57 : f32 to vector<8x256xf32>
    %38 = arith.addf %37, %36 : vector<8x256xf32>
    %39 = arith.divf %37, %38 : vector<8x256xf32>
    %40 = arith.mulf %34, %39 : vector<8x256xf32>
    %c0_58 = arith.constant 0 : index
    %c0_59 = arith.constant 0 : index
    %c0_60 = arith.constant 0 : index
    %c0_61 = arith.constant 0 : index
    %41 = vector.load %arg6[%c0_58, %c0_59, %c0_60, %c0_61] : memref<1x1x8x256xf32, #tpu.memory_space<vmem>>, vector<1x1x8x256xf32>
    %42 = vector.shape_cast %41 : vector<1x1x8x256xf32> to vector<8x256xf32>
    %43 = vector.shape_cast %40 : vector<8x256xf32> to vector<1x1x8x256xf32>
    tpu.vector_store %arg6[%c0_58, %c0_59, %c0_60, %c0_61], %43 {strides = array<i32>} : memref<1x1x8x256xf32, #tpu.memory_space<vmem>>, vector<1x1x8x256xf32>,
    return
  }
  func.func @transform_0(%arg0: i32, %arg1: i32, %arg2: i32) -> (i32, i32, i32, i32, i32, i32) {
    %c0_i32 = arith.constant 0 : i32
    %c0_i32_0 = arith.constant 0 : i32
    %c0_i32_1 = arith.constant 0 : i32
    %c0_i32_2 = arith.constant 0 : i32
    return %arg1, %arg0, %arg2, %c0_i32, %c0_i32_0, %c0_i32_1 : i32, i32, i32, i32, i32, i32
  }
  func.func @transform_1(%arg0: i32, %arg1: i32, %arg2: i32) -> (i32, i32, i32) {
    %c0_i32 = arith.constant 0 : i32
    %c0_i32_0 = arith.constant 0 : i32
    %c0_i32_1 = arith.constant 0 : i32
    return %arg0, %c0_i32, %c0_i32_0 : i32, i32, i32
  }
  func.func @transform_2(%arg0: i32, %arg1: i32, %arg2: i32) -> (i32, i32, i32) {
    %c0_i32 = arith.constant 0 : i32
    %c0_i32_0 = arith.constant 0 : i32
    %c0_i32_1 = arith.constant 0 : i32
    return %arg0, %c0_i32, %c0_i32_0 : i32, i32, i32
  }
  func.func @transform_3(%arg0: i32, %arg1: i32, %arg2: i32) -> (i32, i32, i32, i32) {
    %c0_i32 = arith.constant 0 : i32
    %c0_i32_0 = arith.constant 0 : i32
    return %arg1, %arg0, %c0_i32, %arg2 : i32, i32, i32, i32
  }
}

</mosaic_0001>

<bundles_post_ra>
// kernel: tpu_custom_call.1
= control target key start
LH: loop header
LB: loop body
LE: loop exit
PB: predicated region body
PF: predicated region fallthrough
CT: control target
= control target key end

     0   :  { %8 = vsyncpa [#allocation3], 0  ;;  %s5478_s0 = inlined_call_operand.vmem [shape: bf16[2,1,1,18,18,4], index: 0, kind: input, shape index: {}]   ;;  %s5479_s1 = inlined_call_operand.vmem [shape: bf16[1,8,36], index: 1, kind: input, shape index: {}]   ;;  %s5480_s2 = inlined_call_operand.vmem [shape: f32[1,8,1], index: 2, kind: input, shape index: {}]   ;;  %s5481_s3 = inlined_call_operand.hbm [shape: f32[2,1,8,256], index: 3, kind: output, shape index: {}]  }
   0x1   :  { %10 = vsyncpa [#allocation3 + $0x1], 0  ;;  %s3967_s12 = smov 0   ;;  %s3969_s13 = smov 0  }
   0x2   :  { %s3971_s14 = smov 0   ;;  %s3973_s15 = smov 0  }
   0x3   :  { %s3975_s16 = smov 0   ;;  %s3977_s17 = smov 0  }
   0x4 LB: > { %s3343_s18 = sadd.s32 4294967295, %s3935_s17   ;;  %s3344_s19 = sadd.s32 4294967294, %s3935_s17   ;;  %s3935_s17 = sphi %s3977_s17, %s16_s17   ;;  %s3931_s16 = sphi %s3975_s16, %s5492_s16   ;;  %s3927_s15 = sphi %s3973_s15, %s5491_s15   ;;  %s3923_s14 = sphi %s3971_s14, %s5490_s14   ;;  %s3919_s13 = sphi %s3969_s13, %s5489_s13   ;;  %s3915_s12 = sphi %s3967_s12, %s5488_s12  }
   0x5   : > { %s31_s20 = sadd.s32 1, %s3931_s16  ;;  %s128_s21 = sadd.s32 1, %s3923_s14 }
   0x6   : > { %p33_p0 = scmp.ge.s32.totalorder %s31_s20, 2  ;;  %p138_p1 = scmp.ne.s32.totalorder %s3923_s14, %s3919_s13 }
   0x7   : > { %p139_p2 = scmp.eq.s32.totalorder %s3343_s18, 1  ;;  %p144_p3 = scmp.ne.s32.totalorder %s3919_s13, %s3915_s12 }
   0x8   : > { %s5494_s20 = smov (%p33_p0, %s31_s20), 0  ;;  %p145_p5 = scmp.eq.s32.totalorder %s3344_s19, 1 }
   0x9   : > { %p4007_p4 = por %p139_p2, %p138_p1  ;;  %s121_s23 = ssub.s32 %s3931_s16, %s5494_s20 }
   0xa   : > { %p3349_p6 = scmp.ge.s32.totalorder %s3935_s17, 1  ;;  %p126_p7 = scmp.eq.s32.totalorder %s121_s23, 0 }
   0xb   : > { %p4014_p8 = por %p145_p5, %p144_p3  ;;  %p193_p9 = scmp.lt.s32.totalorder %s3935_s17, 3 }
   0xc   : > { %s4020_s25 = scalar_select %p126_p7, %s3923_s14, %s128_s21  }
   0xd   : > { %p194_p10 = pnand %p3349_p6, %p193_p9 }
   0xe   : > { %p233_p11 = scmp.lt.s32.totalorder (!%p194_p10), %s3927_s15, 1  ;;  %vm755_vm0 = vcmask (!%p194_p10), 1042432   ;;  %vm756_vm1 = vcmask (!%p194_p10), 1046532   ;;  %s3937_s4 = smov (!%p194_p10), 12   ;;  %vm304_vm3 = vsmask.f32 (!%p194_p10), 3328 }
   0xf   : > { %197 = sbr.rel (%p194_p10) target bundleno = 732 (0x2dc), region = 32  ;;  %vm4051_vm2 = vmor (!%p194_p10), %vm755_vm0, %vm756_vm1  ;;  %vm305_vm4 = vsmask.f32 (!%p194_p10), 7440  ;;  %s3938_s5 = smov (!%p194_p10), 20   ;;  %vm2824_vm6 = vcmask (!%p194_p10), 31744   ;;  %vm2873_vm7 = vcmask (!%p194_p10), 64512  }
  0x10   : > { %s3939_s6 = smov (!%p194_p10), 8   ;;  %vm4095_vm5 = vmor (!%p194_p10), %vm304_vm3, %vm305_vm4  ;;  %s3940_s7 = smov (!%p194_p10), 4   ;;  %vm2906_vm8 = vcmask (!%p194_p10), 97280   ;;  %vm2939_vm9 = vcmask (!%p194_p10), 130048   ;;  %vm2972_vm10 = vcmask (!%p194_p10), 162816   ;;  %vm3005_vm11 = vcmask (!%p194_p10), 195584  }
  0x11   : > { %s3941_s8 = smov (!%p194_p10), 16   ;;  %s3942_s9 = smov (!%p194_p10), 24   ;;  %vm3038_vm12 = vcmask (!%p194_p10), 228352   ;;  %vm3071_vm13 = vcmask (!%p194_p10), 261120   ;;  %vm3111_vm14 = vcmask (!%p194_p10), 293888  }
  0x12   : > { %s3943_s10 = smov (!%p194_p10), 28   ;;  %s3944_s11 = smov (!%p194_p10), 32  }
  0x13   : > { %s3680_s28 = sshll.u32 (!%p194_p10), %s3927_s15, 8 }
  0x16   : > { %s234_s26 = scalar_select %p233_p11, %s3927_s15, 1 }
  0x18   : > { %s3707_s27 = smul.u32 216, %s234_s26  ;;  %s230_s26 = sand.u32 1, %s3919_s13  }
  0x1a   : > { %s4027_s30 = scalar_lea.vmem %s5478_s0, %s3707_s27  ;;  %s3350_s27 = sshll.u32 %s230_s26, 4 }
  0x1b   : > { %v3384_v0 = vld [vmem:[%s4027_s30 + $0x6c] sm:$0xf]  ;;  %v4031_v1 = vld [vmem:[%s4027_s30 + $0x70] sm:$0xf]  ;;  %v4044_v12 = vld [vmem:[%s4027_s30 + $0x14] sm:$0x1] }
  0x1c   : > { %v3368_v2 = vld [vmem:[%s4027_s30 + $0xc] sm:$0xf]  ;;  %v1121_v3 = vshll.u32 %v4031_v1, 16  ;;  %v1125_v4 = vshrl.u32 %v4031_v1, 16  ;;  %v3584_v5 = vcombine.low %v3384_v0, %v4031_v1  ;;  %v1112_v6 = vshrl.u32 %v3384_v0, 16  ;;  %s232_s29 = scalar_lea.vmem [#allocation2], %s3350_s27 }
  0x1d   : > { %v4038_v7 = vld [vmem:[%s4027_s30 + $0x10] sm:$0xf]  ;;  %v1115_v8 = vshll.u32 %v3384_v0, 16  ;;  %v920_v15 = vshrl.u32 %v3368_v2, 16  ;;  %v923_v16 = vshll.u32 %v3368_v2, 16  ;;  %v1372_v26 = vrot.slane %v4044_v12, 5 }
  0x1e   : > { %v929_v9 = vshll.u32 %v4038_v7, 16  ;;  %v933_v10 = vshrl.u32 %v4038_v7, 16  ;;  %v3576_v11 = vcombine.low %v3368_v2, %v4038_v7  ;;  %v4046_v13 = vrot.slane %v1125_v4, 4  ;;  %2392 = vrot.lane.b32.xlu1 %v3584_v5, %s3937_s4  ;;  %v3416_v18 = vld [vmem:[%s4027_s30 + $0xc] sm:$0xe] }
  0x1f   : > { %v1114_v14 = vrot.slane %v1112_v6, 4  ;;  %v1117_v19 = vrot.slane %v1115_v8, 5  ;;  %v3432_v21 = vrot.slane %v3416_v18, 9  ;;  %v1369_v22 = vrot.slane %v4038_v7, 5  ;;  %v257_v23 = vld [vmem:[%s4027_s30 + $0x4] sm:$0xf] }
  0x20   : > { %v4056_v20 = vrot.slane %v933_v10, 4  ;;  %2376 = vrot.lane.b32.xlu0 %v3576_v11, %s3937_s4  ;;  %v922_v24 = vrot.slane %v920_v15, 4  ;;  %v925_v25 = vrot.slane %v923_v16, 5  ;;  %v288_v27 = vld [vmem:[%s4027_s30 + $0x8] sm:$0x1]  ;;  %v760_v28 = vrot.slane %v257_v23, 5 }
  0x21   : > { %v1118_v29 = vor.u32 %v1117_v19, %v1114_v14  ;;  %v1370_v30 = vsel %vm4051_vm2, %v3432_v21, %v1369_v22  ;;  %v1371_v31 = vrot.slane %v1369_v22, 4  ;;  %v691_v32 = vld [vmem:[%s4027_s30] sm:$0xe]  ;;  %v763_v33 = vrot.slane %v288_v27, 5  ;;  %v273_v34 = vld [vmem:[%s4027_s30 + $0x64] sm:$0xf] }
  0x22   : > { %v926_v35 = vor.u32 %v925_v25, %v922_v24  ;;  %v3352_v36 = vrot.slane %v691_v32, 9  ;;  %v762_v37 = vrot.slane %v760_v28, 4  ;;  %v296_v38 = vld [vmem:[%s4027_s30 + $0x68] sm:$0x1]  ;;  %v699_v39 = vld [vmem:[%s4027_s30 + $0x60] sm:$0xe] }
  0x23   : > { %v4069_v40 = vrot.slane %v1118_v29, 4  ;;  %v1373_v41 = vsel %vm4051_vm2, %v1371_v31, %v1372_v26  ;;  %v3360_v42 = vrot.slane %v699_v39, 9  ;;  %v816_v43 = vrot.slane %v273_v34, 5  ;;  %v256_v44 = vld [vmem:[%s4027_s30] sm:$0xf] }
  0x24   : > { %v4074_v45 = vrot.slane %v926_v35, 4  ;;  %v3608_v46 = vcombine.low %v1370_v30, %v1373_v41  ;;  %v761_v47 = vsel %vm4051_vm2, %v3352_v36, %v760_v28  ;;  %v764_v48 = vsel %vm4051_vm2, %v762_v37, %v763_v33  ;;  %v3424_v49 = vld [vmem:[%s4027_s30 + $0x6c] sm:$0xe]  ;;  %v3408_v58 = vld [vmem:[%s4027_s30 + $0x74] sm:$0x1] }
  0x25   : > { %v3560_v50 = vcombine.low %v761_v47, %v764_v48  ;;  %v817_v51 = vsel %vm4051_vm2, %v3360_v42, %v816_v43  ;;  %v818_v52 = vrot.slane %v816_v43, 4  ;;  %v819_v53 = vrot.slane %v296_v38, 5  ;;  %v272_v63 = vld [vmem:[%s4027_s30 + $0x60] sm:$0xf]  ;;  %v3464_v42 = vld [vmem:[%s4027_s30 + $0x78] sm:$0xf] }
  0x26   : > { %2536 = vrot.lane.b32.xlu0 %v3608_v46, %s3938_s5  ;;  %v308_v54 = vshrl.u32 %v256_v44, 16  ;;  %v311_v55 = vshll.u32 %v256_v44, 16  ;;  %v317_v56 = vshll.u32 %v257_v23, 16  ;;  %v321_v57 = vshrl.u32 %v257_v23, 16 }
  0x27   : > { %2280 = vrot.lane.b32.xlu1 %v3560_v50, %s3939_s6  ;;  %v820_v59 = vsel %vm4051_vm2, %v818_v52, %v819_v53  ;;  %v327_v60 = vshll.u32 %v288_v27, 16  ;;  %v3440_v61 = vrot.slane %v3424_v49, 9  ;;  %v1425_v62 = vrot.slane %v4031_v1, 5 }
  0x28   : > { %v3568_v0 = vcombine.low %v817_v51, %v820_v59  ;;  %v310_v2 = vrot.slane %v308_v54, 4  ;;  %v313_v4 = vrot.slane %v311_v55, 5  ;;  %v319_v5 = vrot.slane %v317_v56, 5  ;;  %v3448_v51 = vld [vmem:[%s4027_s30 + $0x18] sm:$0xf] }
  0x29   : > { %v323_v6 = vrot.slane %v321_v57, 4  ;;  %v329_v8 = vrot.slane %v327_v60, 5  ;;  %v1426_v10 = vsel %vm4051_vm2, %v3440_v61, %v1425_v62  ;;  %v1427_v11 = vrot.slane %v1425_v62, 4  ;;  %v3488_v62 = vld [vmem:[%s4027_s30 + $0x80] sm:$0x1] }
  0x2a   : > { %v314_v14 = vor.u32 %v313_v4, %v310_v2  ;;  %v1428_v15 = vrot.slane %v3408_v58, 5  ;;  %v500_v16 = vshrl.u32 %v272_v63, 16  ;;  %v503_v18 = vshll.u32 %v272_v63, 16 }
  0x2b   : > { %2296 = vrot.lane.b32.xlu1 %v3568_v0, %s3939_s6  ;;  %v324_v21 = vor.u32 %v323_v6, %v319_v5  ;;  %v509_v22 = vshll.u32 %v273_v34, 16  ;;  %v513_v23 = vshrl.u32 %v273_v34, 16  ;;  %v519_v24 = vshll.u32 %v296_v38, 16 }
  0x2c   : > { %v315_v25 = vrot.slane %v314_v14, 4  ;;  %v1429_v26 = vsel %vm4051_vm2, %v1427_v11, %v1428_v15  ;;  %v502_v27 = vrot.slane %v500_v16, 4  ;;  %v505_v28 = vrot.slane %v503_v18, 5  ;;  %v3504_v14 = vld [vmem:[%s4027_s30 + $0x78] sm:$0xe] }
  0x2d   : > { %v325_v29 = vrot.slane %v324_v21, 4  ;;  %v3616_v30 = vcombine.low %v1426_v10, %v1429_v26  ;;  %v511_v31 = vrot.slane %v509_v22, 5  ;;  %v515_v32 = vrot.slane %v513_v23, 4  ;;  %v3496_v26 = vld [vmem:[%s4027_s30 + $0x18] sm:$0xe] }
  0x2e   : > { %v320_v33 = vsel %vm4095_vm5, %v315_v25, %v319_v5  ;;  %v506_v35 = vor.u32 %v505_v28, %v502_v27  ;;  %v521_v36 = vrot.slane %v519_v24, 5  ;;  %v1123_v34 = vrot.slane %v1121_v3, 5  ;;  %v4116_v3 = vld [vmem:[%s4027_s30 + $0x7c] sm:$0xf]  ;;  %v3480_v5 = vld [vmem:[%s4027_s30 + $0x20] sm:$0x1] }
  0x2f   : > { %v330_v37 = vsel %vm4095_vm5, %v325_v29, %v329_v8  ;;  %2552 = vrot.lane.b32.xlu1 %v3616_v30, %s3938_s5  ;;  %v516_v38 = vor.u32 %v515_v32, %v511_v31  ;;  %v1131_v39 = vshll.u32 %v3408_v58, 16  ;;  %v931_v41 = vrot.slane %v929_v9, 5 }
  0x30   : > { %v3544_v43 = vcombine.low %v320_v33, %v330_v37  ;;  %v507_v44 = vrot.slane %v506_v35, 4  ;;  %v1124_v46 = vsel %vm4095_vm5, %v4069_v40, %v1123_v34  ;;  %v1128_v1 = vor.u32 %v4046_v13, %v1123_v34 }
  0x31   : > { %v517_v47 = vrot.slane %v516_v38, 4  ;;  %v1133_v48 = vrot.slane %v1131_v39, 5  ;;  %v932_v7 = vsel %vm4095_vm5, %v4074_v45, %v931_v41  ;;  %v936_v9 = vor.u32 %v4056_v20, %v931_v41  ;;  %v3449_v20 = vld [vmem:[%s4027_s30 + $0x1c] sm:$0xf] }
  0x32   : > { %2200 = vrot.lane.b32.xlu0 %v3544_v43, %s3940_s7  ;;  %v512_v49 = vsel %vm4095_vm5, %v507_v44, %v511_v31  ;;  %v1129_v40 = vrot.slane %v1128_v1, 4  ;;  %v939_v13 = vshll.u32 %v4044_v12, 16  ;;  %v1721_v50 = vshrl.u32 %v3464_v42, 16 }
  0x33   : > { %v522_v52 = vsel %vm4095_vm5, %v517_v47, %v521_v36  ;;  %v937_v53 = vrot.slane %v936_v9, 4  ;;  %v1724_v54 = vshll.u32 %v3464_v42, 16  ;;  %v1734_v45 = vshrl.u32 %v4116_v3, 16  ;;  %v274_v36 = vld [vmem:[%s4027_s30 + $0x6c] sm:$0xf] }
  0x34   : > { %v3552_v55 = vcombine.low %v512_v49, %v522_v52  ;;  %v1134_v56 = vsel %vm4095_vm5, %v1129_v40, %v1133_v48  ;;  %v941_v57 = vrot.slane %v939_v13, 5  ;;  %v1723_v58 = vrot.slane %v1721_v50, 4  ;;  %v275_v47 = vld [vmem:[%s4027_s30 + $0x70] sm:$0xf]  ;;  %v297_v13 = vld [vmem:[%s4027_s30 + $0x74] sm:$0x1] }
  0x35   : > { %v3600_v59 = vcombine.low %v1124_v46, %v1134_v56  ;;  %v1726_v12 = vrot.slane %v1724_v54, 5  ;;  %v3632_v60 = vcombine.low %v3464_v42, %v4116_v3  ;;  %v1529_v61 = vshrl.u32 %v3448_v51, 16  ;;  %v258_v50 = vld [vmem:[%s4027_s30 + $0xc] sm:$0xf] }
  0x36   : > { %2216 = vrot.lane.b32.xlu0 %v3552_v55, %s3940_s7  ;;  %v942_v63 = vsel %vm4095_vm5, %v937_v53, %v941_v57  ;;  %v1532_v0 = vshll.u32 %v3448_v51, 16  ;;  %v1542_v2 = vshrl.u32 %v3449_v20, 16  ;;  %v3624_v4 = vcombine.low %v3448_v51, %v3449_v20 }
  0x37   : > { %2472 = vrot.lane.b32.xlu1 %v3600_v59, %s3941_s8  ;;  %v3592_v6 = vcombine.low %v932_v7, %v942_v63  ;;  %v1531_v8 = vrot.slane %v1529_v61, 4  ;;  %v1727_v10 = vor.u32 %v1726_v12, %v1723_v58  ;;  %v1730_v11 = vshll.u32 %v4116_v3, 16 }
  0x38   : > { %v1534_v15 = vrot.slane %v1532_v0, 5  ;;  %v1736_v16 = vrot.slane %v1734_v45, 4  ;;  %v1740_v18 = vshll.u32 %v3488_v62, 16  ;;  %v1538_v21 = vshll.u32 %v3449_v20, 16  ;;  %v259_v45 = vld [vmem:[%s4027_s30 + $0x10] sm:$0xf] }
  0x39   : > { %v1728_v22 = vrot.slane %v1727_v10, 4  ;;  %v1732_v23 = vrot.slane %v1730_v11, 5  ;;  %v1544_v24 = vrot.slane %v1542_v2, 4  ;;  %v1548_v25 = vshll.u32 %v3480_v5, 16 }
  0x3a   : > { %2456 = vrot.lane.b32.xlu0 %v3592_v6, %s3941_s8  ;;  %v1742_v27 = vrot.slane %v1740_v18, 5  ;;  %v1535_v28 = vor.u32 %v1534_v15, %v1531_v8  ;;  %v1540_v29 = vrot.slane %v1538_v21, 5  ;;  %v3520_v30 = vrot.slane %v3504_v14, 9 }
  0x3b   : > { %2648 = vrot.lane.b32.xlu1 %v3632_v60, %s3942_s9  ;;  %v1733_v31 = vsel %vm4095_vm5, %v1728_v22, %v1732_v23  ;;  %v1737_v32 = vor.u32 %v1736_v16, %v1732_v23  ;;  %v1550_v33 = vrot.slane %v1548_v25, 5  ;;  %v2034_v35 = vrot.slane %v4116_v3, 5  ;;  %v289_v60 = vld [vmem:[%s4027_s30 + $0x14] sm:$0x1] }
  0x3c   : > { %v1536_v34 = vrot.slane %v1535_v28, 4  ;;  %v1545_v37 = vor.u32 %v1544_v24, %v1540_v29  ;;  %v2037_v38 = vrot.slane %v3488_v62, 5  ;;  %v3512_v39 = vrot.slane %v3496_v26, 9  ;;  %v692_v24 = vld [vmem:[%s4027_s30 + $0xc] sm:$0xe] }
  0x3d   : > { %v1738_v41 = vrot.slane %v1737_v32, 4  ;;  %v2035_v42 = vsel %vm4051_vm2, %v3520_v30, %v2034_v35  ;;  %v2036_v43 = vrot.slane %v2034_v35, 4  ;;  %v1978_v44 = vrot.slane %v3449_v20, 5 }
  0x3e   : > { %2632 = vrot.lane.b32.xlu0 %v3624_v4, %s3942_s9  ;;  %v1541_v46 = vsel %vm4095_vm5, %v1536_v34, %v1540_v29  ;;  %v1546_v1 = vrot.slane %v1545_v37, 4  ;;  %v1981_v3 = vrot.slane %v3480_v5, 5  ;;  %v524_v48 = vshrl.u32 %v274_v36, 16  ;;  %v700_v4 = vld [vmem:[%s4027_s30 + $0x6c] sm:$0xe] }
  0x3f   : > { %v1743_v7 = vsel %vm4095_vm5, %v1738_v41, %v1742_v27  ;;  %v2038_v9 = vsel %vm4051_vm2, %v2036_v43, %v2037_v38  ;;  %v1979_v49 = vsel %vm4051_vm2, %v3512_v39, %v1978_v44  ;;  %v1980_v40 = vrot.slane %v1978_v44, 4  ;;  %v3386_v37 = vld [vmem:[%s4027_s30 + $0x78] sm:$0xf]  ;;  %v3387_v43 = vld [vmem:[%s4027_s30 + $0x7c] sm:$0xf] }
  0x40   : > { %v3648_v51 = vcombine.low %v1733_v31, %v1743_v7  ;;  %v1551_v52 = vsel %vm4095_vm5, %v1546_v1, %v1550_v33  ;;  %v3664_v53 = vcombine.low %v2035_v42, %v2038_v9  ;;  %v526_v54 = vrot.slane %v524_v48, 4  ;;  %v3370_v44 = vld [vmem:[%s4027_s30 + $0x18] sm:$0xf] }
  0x41   : > { %v3640_v20 = vcombine.low %v1541_v46, %v1551_v52  ;;  %v1982_v55 = vsel %vm4051_vm2, %v1980_v40, %v1981_v3  ;;  %v527_v56 = vshll.u32 %v274_v36, 16  ;;  %v533_v57 = vshll.u32 %v275_v47, 16  ;;  %v3371_v40 = vld [vmem:[%s4027_s30 + $0x1c] sm:$0xf] }
  0x42   : > { %2728 = vrot.lane.b32.xlu1 %v3648_v51, %s3943_s10  ;;  %v3656_v58 = vcombine.low %v1979_v49, %v1982_v55  ;;  %v537_v59 = vshrl.u32 %v275_v47, 16  ;;  %v543_v12 = vshll.u32 %v297_v13, 16  ;;  %v332_v61 = vshrl.u32 %v258_v50, 16 }
  0x43   : > { %2712 = vrot.lane.b32.xlu0 %v3640_v20, %s3943_s10  ;;  %v529_v62 = vrot.slane %v527_v56, 5  ;;  %v535_v63 = vrot.slane %v533_v57, 5  ;;  %v335_v0 = vshll.u32 %v258_v50, 16  ;;  %v341_v2 = vshll.u32 %v259_v45, 16  ;;  %v3401_v56 = vld [vmem:[%s4027_s30 + $0x20] sm:$0x1] }
  0x44   : > { %v539_v5 = vrot.slane %v537_v59, 4  ;;  %v545_v6 = vrot.slane %v543_v12, 5  ;;  %v334_v8 = vrot.slane %v332_v61, 4  ;;  %v345_v10 = vshrl.u32 %v259_v45, 16 }
  0x45   : > { %v530_v11 = vor.u32 %v529_v62, %v526_v54  ;;  %v337_v14 = vrot.slane %v335_v0, 5  ;;  %v343_v15 = vrot.slane %v341_v2, 5  ;;  %v351_v16 = vshll.u32 %v289_v60, 16 }
  0x46   : > { %2808 = vrot.lane.b32.xlu1 %v3664_v53, %s3944_s11  ;;  %v540_v18 = vor.u32 %v539_v5, %v535_v63  ;;  %v347_v21 = vrot.slane %v345_v10, 4  ;;  %v3361_v22 = vrot.slane %v700_v4, 9  ;;  %v823_v23 = vrot.slane %v275_v47, 5  ;;  %v3409_v53 = vld [vmem:[%s4027_s30 + $0x80] sm:$0x1] }
  0x47   : > { %2792 = vrot.lane.b32.xlu0 %v3656_v58, %s3944_s11  ;;  %v531_v25 = vrot.slane %v530_v11, 4  ;;  %v338_v26 = vor.u32 %v337_v14, %v334_v8  ;;  %v353_v27 = vrot.slane %v351_v16, 5  ;;  %v826_v28 = vrot.slane %v297_v13, 5 }
  0x48   : > { %v541_v29 = vrot.slane %v540_v18, 4  ;;  %v348_v30 = vor.u32 %v347_v21, %v343_v15  ;;  %v824_v31 = vsel %vm4051_vm2, %v3361_v22, %v823_v23  ;;  %v825_v32 = vrot.slane %v823_v23, 4 }
  0x49   : > { %v536_v33 = vsel %vm4095_vm5, %v531_v25, %v535_v63  ;;  %v339_v35 = vrot.slane %v338_v26, 4  ;;  %v3353_v36 = vrot.slane %v692_v24, 9  ;;  %v767_v34 = vrot.slane %v259_v45, 5 }
  0x4a   : > { %v546_v38 = vsel %vm4095_vm5, %v541_v29, %v545_v6  ;;  %v349_v39 = vrot.slane %v348_v30, 4  ;;  %v827_v41 = vsel %vm4051_vm2, %v825_v32, %v826_v28  ;;  %v770_v42 = vrot.slane %v289_v60, 5  ;;  %v3425_v60 = vld [vmem:[%s4027_s30 + $0x78] sm:$0xe] }
  0x4b   : > { %v3553_v46 = vcombine.low %v536_v33, %v546_v38  ;;  %v344_v1 = vsel %vm4095_vm5, %v339_v35, %v343_v15  ;;  %v3569_v3 = vcombine.low %v824_v31, %v827_v41  ;;  %v768_v47 = vsel %vm4051_vm2, %v3353_v36, %v767_v34  ;;  %v3417_v15 = vld [vmem:[%s4027_s30 + $0x18] sm:$0xe]  ;;  %v3467_v38 = vld [vmem:[%s4027_s30 + $0x88] sm:$0xf] }
  0x4c   : > { %v354_v48 = vsel %vm4095_vm5, %v349_v39, %v353_v27  ;;  %v769_v7 = vrot.slane %v767_v34, 4  ;;  %v1136_v9 = vshrl.u32 %v3386_v37, 16  ;;  %v1139_v49 = vshll.u32 %v3386_v37, 16  ;;  %v4206_v27 = vld [vmem:[%s4027_s30 + $0x84] sm:$0xf] }
  0x4d   : > { %2218 = vrot.lane.b32.xlu1 %v3553_v46, %s3940_s7  ;;  %v3545_v13 = vcombine.low %v344_v1, %v354_v48  ;;  %v1149_v50 = vshrl.u32 %v3387_v43, 16  ;;  %v3585_v51 = vcombine.low %v3386_v37, %v3387_v43  ;;  %v944_v52 = vshrl.u32 %v3370_v44, 16  ;;  %v3450_v1 = vld [vmem:[%s4027_s30 + $0x24] sm:$0xf] }
  0x4e   : > { %v771_v54 = vsel %vm4051_vm2, %v769_v7, %v770_v42  ;;  %v1138_v45 = vrot.slane %v1136_v9, 4  ;;  %v1141_v20 = vrot.slane %v1139_v49, 5  ;;  %v947_v55 = vshll.u32 %v3370_v44, 16 }
  0x4f   : > { %2202 = vrot.lane.b32.xlu0 %v3545_v13, %s3940_s7  ;;  %v3561_v57 = vcombine.low %v768_v47, %v771_v54  ;;  %v946_v58 = vrot.slane %v944_v52, 4  ;;  %v957_v59 = vshrl.u32 %v3371_v40, 16  ;;  %v3577_v12 = vcombine.low %v3370_v44, %v3371_v40 }
  0x50   : > { %v949_v61 = vrot.slane %v947_v55, 5  ;;  %v1142_v62 = vor.u32 %v1141_v20, %v1138_v45  ;;  %v1145_v63 = vshll.u32 %v3387_v43, 16  ;;  %v1151_v0 = vrot.slane %v1149_v50, 4  ;;  %v3481_v20 = vld [vmem:[%s4027_s30 + $0x2c] sm:$0x1] }
  0x51   : > { %2298 = vrot.lane.b32.xlu1 %v3569_v3, %s3939_s6  ;;  %v1155_v2 = vshll.u32 %v3409_v53, 16  ;;  %v953_v4 = vshll.u32 %v3371_v40, 16  ;;  %v959_v5 = vrot.slane %v957_v59, 4  ;;  %v963_v6 = vshll.u32 %v3401_v56, 16  ;;  %v3451_v3 = vld [vmem:[%s4027_s30 + $0x28] sm:$0xf] }
  0x52   : > { %v1143_v8 = vrot.slane %v1142_v62, 4  ;;  %v1147_v10 = vrot.slane %v1145_v63, 5  ;;  %v950_v11 = vor.u32 %v949_v61, %v946_v58  ;;  %v3441_v14 = vrot.slane %v3425_v60, 9  ;;  %v3505_v59 = vld [vmem:[%s4027_s30 + $0x84] sm:$0xe] }
  0x53   : > { %2282 = vrot.lane.b32.xlu0 %v3561_v57, %s3939_s6  ;;  %v1157_v16 = vrot.slane %v1155_v2, 5  ;;  %v955_v18 = vrot.slane %v953_v4, 5  ;;  %v965_v21 = vrot.slane %v963_v6, 5  ;;  %v1432_v22 = vrot.slane %v3387_v43, 5 }
  0x54   : > { %v1148_v23 = vsel %vm4095_vm5, %v1143_v8, %v1147_v10  ;;  %v1152_v24 = vor.u32 %v1151_v0, %v1147_v10  ;;  %v951_v25 = vrot.slane %v950_v11, 4  ;;  %v1435_v26 = vrot.slane %v3409_v53, 5 }
  0x55   : > { %2394 = vrot.lane.b32.xlu1 %v3585_v51, %s3937_s4  ;;  %v960_v28 = vor.u32 %v959_v5, %v955_v18  ;;  %v1433_v29 = vsel %vm4051_vm2, %v3441_v14, %v1432_v22  ;;  %v1434_v30 = vrot.slane %v1432_v22, 4  ;;  %v3433_v31 = vrot.slane %v3417_v15, 9  ;;  %v3489_v51 = vld [vmem:[%s4027_s30 + $0x8c] sm:$0x1]  ;;  %v3497_v5 = vld [vmem:[%s4027_s30 + $0x24] sm:$0xe] }
  0x56   : > { %v1153_v32 = vrot.slane %v1152_v24, 4  ;;  %v956_v33 = vsel %vm4095_vm5, %v951_v25, %v955_v18  ;;  %v1376_v35 = vrot.slane %v3371_v40, 5  ;;  %v1379_v36 = vrot.slane %v3401_v56, 5 }
  0x57   : > { %2378 = vrot.lane.b32.xlu0 %v3577_v12, %s3937_s4  ;;  %v961_v34 = vrot.slane %v960_v28, 4  ;;  %v1436_v37 = vsel %vm4051_vm2, %v1434_v30, %v1435_v26  ;;  %v1745_v39 = vshrl.u32 %v4206_v27, 16  ;;  %v1748_v41 = vshll.u32 %v4206_v27, 16 }
  0x58   : > { %v1158_v42 = vsel %vm4095_vm5, %v1153_v32, %v1157_v16  ;;  %v3617_v43 = vcombine.low %v1433_v29, %v1436_v37  ;;  %v1377_v44 = vsel %vm4051_vm2, %v3433_v31, %v1376_v35  ;;  %v1378_v46 = vrot.slane %v1376_v35, 4 }
  0x59   : > { %v3601_v47 = vcombine.low %v1148_v23, %v1158_v42  ;;  %v966_v48 = vsel %vm4095_vm5, %v961_v34, %v965_v21  ;;  %v1747_v7 = vrot.slane %v1745_v39, 4  ;;  %v1750_v9 = vrot.slane %v1748_v41, 5  ;;  %v276_v21 = vld [vmem:[%s4027_s30 + $0x78] sm:$0xf]  ;;  %v298_v39 = vld [vmem:[%s4027_s30 + $0x80] sm:$0x1] }
  0x5a   : > { %v3593_v49 = vcombine.low %v956_v33, %v966_v48  ;;  %v1380_v40 = vsel %vm4051_vm2, %v1378_v46, %v1379_v36  ;;  %v1758_v13 = vshrl.u32 %v3467_v38, 16  ;;  %v3633_v50 = vcombine.low %v4206_v27, %v3467_v38  ;;  %v277_v33 = vld [vmem:[%s4027_s30 + $0x7c] sm:$0xf]  ;;  %v260_v41 = vld [vmem:[%s4027_s30 + $0x18] sm:$0xf] }
  0x5b   : > { %2474 = vrot.lane.b32.xlu1 %v3601_v47, %s3941_s8  ;;  %v3609_v52 = vcombine.low %v1377_v44, %v1380_v40  ;;  %v1553_v53 = vshrl.u32 %v3450_v1, 16  ;;  %v1556_v54 = vshll.u32 %v3450_v1, 16  ;;  %v1566_v45 = vshrl.u32 %v3451_v3, 16 }
  0x5c   : > { %2458 = vrot.lane.b32.xlu0 %v3593_v49, %s3941_s8  ;;  %v3625_v55 = vcombine.low %v3450_v1, %v3451_v3  ;;  %v1751_v56 = vor.u32 %v1750_v9, %v1747_v7  ;;  %v1754_v57 = vshll.u32 %v3467_v38, 16  ;;  %v1760_v58 = vrot.slane %v1758_v13, 4  ;;  %v261_v1 = vld [vmem:[%s4027_s30 + $0x1c] sm:$0xf]  ;;  %v290_v13 = vld [vmem:[%s4027_s30 + $0x20] sm:$0x1] }
  0x5d   : > { %v1555_v12 = vrot.slane %v1553_v53, 4  ;;  %v1558_v60 = vrot.slane %v1556_v54, 5  ;;  %v1764_v61 = vshll.u32 %v3489_v51, 16  ;;  %v1562_v62 = vshll.u32 %v3451_v3, 16 }
  0x5e   : > { %v1752_v63 = vrot.slane %v1751_v56, 4  ;;  %v1756_v0 = vrot.slane %v1754_v57, 5  ;;  %v1568_v2 = vrot.slane %v1566_v45, 4  ;;  %v1572_v4 = vshll.u32 %v3481_v20, 16  ;;  %v701_v45 = vld [vmem:[%s4027_s30 + $0x78] sm:$0xe] }
  0x5f   : > { %2554 = vrot.lane.b32.xlu1 %v3617_v43, %s3938_s5  ;;  %v1766_v6 = vrot.slane %v1764_v61, 5  ;;  %v1559_v8 = vor.u32 %v1558_v60, %v1555_v12  ;;  %v1564_v10 = vrot.slane %v1562_v62, 5  ;;  %v3521_v11 = vrot.slane %v3505_v59, 9 }
  0x60   : > { %2538 = vrot.lane.b32.xlu0 %v3609_v52, %s3938_s5  ;;  %v1757_v14 = vsel %vm4095_vm5, %v1752_v63, %v1756_v0  ;;  %v1761_v15 = vor.u32 %v1760_v58, %v1756_v0  ;;  %v1574_v16 = vrot.slane %v1572_v4, 5  ;;  %v2041_v18 = vrot.slane %v3467_v38, 5 }
  0x61   : > { %v1560_v22 = vrot.slane %v1559_v8, 4  ;;  %v1569_v23 = vor.u32 %v1568_v2, %v1564_v10  ;;  %v2044_v24 = vrot.slane %v3489_v51, 5  ;;  %v3513_v25 = vrot.slane %v3497_v5, 9  ;;  %v693_v2 = vld [vmem:[%s4027_s30 + $0x18] sm:$0xe] }
  0x62   : > { %v1762_v26 = vrot.slane %v1761_v15, 4  ;;  %v2042_v27 = vsel %vm4051_vm2, %v3521_v11, %v2041_v18  ;;  %v2043_v28 = vrot.slane %v2041_v18, 4  ;;  %v1985_v29 = vrot.slane %v3451_v3, 5 }
  0x63   : > { %2650 = vrot.lane.b32.xlu1 %v3633_v50, %s3942_s9  ;;  %v1565_v30 = vsel %vm4095_vm5, %v1560_v22, %v1564_v10  ;;  %v1570_v31 = vrot.slane %v1569_v23, 4  ;;  %v1988_v32 = vrot.slane %v3481_v20, 5  ;;  %v548_v35 = vshrl.u32 %v276_v21, 16  ;;  %v3388_v23 = vld [vmem:[%s4027_s30 + $0x84] sm:$0xf] }
  0x64   : > { %2634 = vrot.lane.b32.xlu0 %v3625_v55, %s3942_s9  ;;  %v1767_v36 = vsel %vm4095_vm5, %v1762_v26, %v1766_v6  ;;  %v2045_v34 = vsel %vm4051_vm2, %v2043_v28, %v2044_v24  ;;  %v1986_v37 = vsel %vm4051_vm2, %v3513_v25, %v1985_v29  ;;  %v1987_v38 = vrot.slane %v1985_v29, 4  ;;  %v3389_v28 = vld [vmem:[%s4027_s30 + $0x88] sm:$0xf]  ;;  %v3372_v29 = vld [vmem:[%s4027_s30 + $0x24] sm:$0xf] }
  0x65   : > { %v3649_v42 = vcombine.low %v1757_v14, %v1767_v36  ;;  %v1575_v43 = vsel %vm4095_vm5, %v1570_v31, %v1574_v16  ;;  %v3665_v44 = vcombine.low %v2042_v27, %v2045_v34  ;;  %v550_v46 = vrot.slane %v548_v35, 4 }
  0x66   : > { %v3641_v3 = vcombine.low %v1565_v30, %v1575_v43  ;;  %v1989_v47 = vsel %vm4051_vm2, %v1987_v38, %v1988_v32  ;;  %v551_v48 = vshll.u32 %v276_v21, 16  ;;  %v557_v7 = vshll.u32 %v277_v33, 16  ;;  %v3373_v38 = vld [vmem:[%s4027_s30 + $0x28] sm:$0xf] }
  0x67   : > { %2730 = vrot.lane.b32.xlu1 %v3649_v42, %s3943_s10  ;;  %v3657_v9 = vcombine.low %v1986_v37, %v1989_v47  ;;  %v561_v49 = vshrl.u32 %v277_v33, 16  ;;  %v567_v40 = vshll.u32 %v298_v39, 16  ;;  %v356_v50 = vshrl.u32 %v260_v41, 16 }
  0x68   : > { %2714 = vrot.lane.b32.xlu0 %v3641_v3, %s3943_s10  ;;  %v553_v51 = vrot.slane %v551_v48, 5  ;;  %v559_v52 = vrot.slane %v557_v7, 5  ;;  %v359_v53 = vshll.u32 %v260_v41, 16  ;;  %v365_v54 = vshll.u32 %v261_v1, 16  ;;  %v3402_v48 = vld [vmem:[%s4027_s30 + $0x2c] sm:$0x1] }
  0x69   : > { %v563_v20 = vrot.slane %v561_v49, 4  ;;  %v569_v55 = vrot.slane %v567_v40, 5  ;;  %v358_v56 = vrot.slane %v356_v50, 4  ;;  %v369_v57 = vshrl.u32 %v261_v1, 16 }
  0x6a   : > { %v554_v58 = vor.u32 %v553_v51, %v550_v46  ;;  %v361_v59 = vrot.slane %v359_v53, 5  ;;  %v367_v12 = vrot.slane %v365_v54, 5  ;;  %v375_v60 = vshll.u32 %v290_v13, 16 }
  0x6b   : > { %2810 = vrot.lane.b32.xlu1 %v3665_v44, %s3944_s11  ;;  %v564_v61 = vor.u32 %v563_v20, %v559_v52  ;;  %v371_v62 = vrot.slane %v369_v57, 4  ;;  %v3362_v63 = vrot.slane %v701_v45, 9  ;;  %v830_v0 = vrot.slane %v277_v33, 5  ;;  %v3410_v44 = vld [vmem:[%s4027_s30 + $0x8c] sm:$0x1] }
  0x6c   : > { %2794 = vrot.lane.b32.xlu0 %v3657_v9, %s3944_s11  ;;  %v555_v4 = vrot.slane %v554_v58, 4  ;;  %v362_v5 = vor.u32 %v361_v59, %v358_v56  ;;  %v377_v6 = vrot.slane %v375_v60, 5  ;;  %v833_v8 = vrot.slane %v298_v39, 5 }
  0x6d   : > { %v565_v10 = vrot.slane %v564_v61, 4  ;;  %v372_v11 = vor.u32 %v371_v62, %v367_v12  ;;  %v831_v14 = vsel %vm4051_vm2, %v3362_v63, %v830_v0  ;;  %v832_v15 = vrot.slane %v830_v0, 4 }
  0x6e   : > { %v560_v16 = vsel %vm4095_vm5, %v555_v4, %v559_v52  ;;  %v363_v18 = vrot.slane %v362_v5, 4  ;;  %v3354_v21 = vrot.slane %v693_v2, 9  ;;  %v774_v22 = vrot.slane %v261_v1, 5 }
  0x6f   : > { %v570_v24 = vsel %vm4095_vm5, %v565_v10, %v569_v55  ;;  %v373_v25 = vrot.slane %v372_v11, 4  ;;  %v834_v26 = vsel %vm4051_vm2, %v832_v15, %v833_v8  ;;  %v777_v27 = vrot.slane %v290_v13, 5  ;;  %v3426_v13 = vld [vmem:[%s4027_s30 + $0x84] sm:$0xe] }
  0x70   : > { %v3554_v30 = vcombine.low %v560_v16, %v570_v24  ;;  %v368_v31 = vsel %vm4095_vm5, %v363_v18, %v367_v12  ;;  %v3570_v32 = vcombine.low %v831_v14, %v834_v26  ;;  %v775_v33 = vsel %vm4051_vm2, %v3354_v21, %v774_v22  ;;  %v3418_v12 = vld [vmem:[%s4027_s30 + $0x24] sm:$0xe]  ;;  %v3469_v24 = vld [vmem:[%s4027_s30 + $0x94] sm:$0xf] }
  0x71   : > { %v378_v35 = vsel %vm4095_vm5, %v373_v25, %v377_v6  ;;  %v776_v36 = vrot.slane %v774_v22, 4  ;;  %v1160_v34 = vshrl.u32 %v3388_v23, 16  ;;  %v1163_v37 = vshll.u32 %v3388_v23, 16  ;;  %v4299_v6 = vld [vmem:[%s4027_s30 + $0x90] sm:$0xf] }
  0x72   : > { %2220 = vrot.lane.b32.xlu1 %v3554_v30, %s3940_s7  ;;  %v3546_v39 = vcombine.low %v368_v31, %v378_v35  ;;  %v1173_v41 = vshrl.u32 %v3389_v28, 16  ;;  %v3586_v42 = vcombine.low %v3388_v23, %v3389_v28  ;;  %v968_v43 = vshrl.u32 %v3372_v29, 16  ;;  %v3452_v31 = vld [vmem:[%s4027_s30 + $0x30] sm:$0xf] }
  0x73   : > { %v778_v46 = vsel %vm4051_vm2, %v776_v36, %v777_v27  ;;  %v1162_v1 = vrot.slane %v1160_v34, 4  ;;  %v1165_v3 = vrot.slane %v1163_v37, 5  ;;  %v971_v47 = vshll.u32 %v3372_v29, 16 }
  0x74   : > { %2204 = vrot.lane.b32.xlu0 %v3546_v39, %s3940_s7  ;;  %v3562_v7 = vcombine.low %v775_v33, %v778_v46  ;;  %v970_v9 = vrot.slane %v968_v43, 4  ;;  %v981_v49 = vshrl.u32 %v3373_v38, 16  ;;  %v3578_v40 = vcombine.low %v3372_v29, %v3373_v38 }
  0x75   : > { %v973_v50 = vrot.slane %v971_v47, 5  ;;  %v1166_v51 = vor.u32 %v1165_v3, %v1162_v1  ;;  %v1169_v52 = vshll.u32 %v3389_v28, 16  ;;  %v1175_v53 = vrot.slane %v1173_v41, 4  ;;  %v3482_v3 = vld [vmem:[%s4027_s30 + $0x38] sm:$0x1] }
  0x76   : > { %2300 = vrot.lane.b32.xlu1 %v3570_v32, %s3939_s6  ;;  %v1179_v54 = vshll.u32 %v3410_v44, 16  ;;  %v977_v45 = vshll.u32 %v3373_v38, 16  ;;  %v983_v20 = vrot.slane %v981_v49, 4  ;;  %v987_v55 = vshll.u32 %v3402_v48, 16  ;;  %v3453_v32 = vld [vmem:[%s4027_s30 + $0x34] sm:$0xf] }
  0x77   : > { %v1167_v56 = vrot.slane %v1166_v51, 4  ;;  %v1171_v57 = vrot.slane %v1169_v52, 5  ;;  %v974_v58 = vor.u32 %v973_v50, %v970_v9  ;;  %v3442_v59 = vrot.slane %v3426_v13, 9  ;;  %v3506_v49 = vld [vmem:[%s4027_s30 + $0x90] sm:$0xe] }
  0x78   : > { %2284 = vrot.lane.b32.xlu0 %v3562_v7, %s3939_s6  ;;  %v1181_v60 = vrot.slane %v1179_v54, 5  ;;  %v979_v61 = vrot.slane %v977_v45, 5  ;;  %v989_v62 = vrot.slane %v987_v55, 5  ;;  %v1439_v63 = vrot.slane %v3389_v28, 5 }
  0x79   : > { %v1172_v0 = vsel %vm4095_vm5, %v1167_v56, %v1171_v57  ;;  %v1176_v2 = vor.u32 %v1175_v53, %v1171_v57  ;;  %v975_v4 = vrot.slane %v974_v58, 4  ;;  %v1442_v5 = vrot.slane %v3410_v44, 5 }
  0x7a   : > { %2396 = vrot.lane.b32.xlu1 %v3586_v42, %s3937_s4  ;;  %v984_v8 = vor.u32 %v983_v20, %v979_v61  ;;  %v1440_v10 = vsel %vm4051_vm2, %v3442_v59, %v1439_v63  ;;  %v1441_v11 = vrot.slane %v1439_v63, 4  ;;  %v3434_v14 = vrot.slane %v3418_v12, 9  ;;  %v3490_v42 = vld [vmem:[%s4027_s30 + $0x98] sm:$0x1]  ;;  %v3498_v20 = vld [vmem:[%s4027_s30 + $0x30] sm:$0xe] }
  0x7b   : > { %v1177_v15 = vrot.slane %v1176_v2, 4  ;;  %v980_v16 = vsel %vm4095_vm5, %v975_v4, %v979_v61  ;;  %v1383_v18 = vrot.slane %v3373_v38, 5  ;;  %v1386_v21 = vrot.slane %v3402_v48, 5 }
  0x7c   : > { %2380 = vrot.lane.b32.xlu0 %v3578_v40, %s3937_s4  ;;  %v985_v22 = vrot.slane %v984_v8, 4  ;;  %v1443_v23 = vsel %vm4051_vm2, %v1441_v11, %v1442_v5  ;;  %v1769_v25 = vshrl.u32 %v4299_v6, 16  ;;  %v1772_v26 = vshll.u32 %v4299_v6, 16 }
  0x7d   : > { %v1182_v27 = vsel %vm4095_vm5, %v1177_v15, %v1181_v60  ;;  %v3618_v28 = vcombine.low %v1440_v10, %v1443_v23  ;;  %v1384_v29 = vsel %vm4051_vm2, %v3434_v14, %v1383_v18  ;;  %v1385_v30 = vrot.slane %v1383_v18, 4 }
  0x7e   : > { %v3602_v33 = vcombine.low %v1172_v0, %v1182_v27  ;;  %v990_v35 = vsel %vm4095_vm5, %v985_v22, %v989_v62  ;;  %v1771_v36 = vrot.slane %v1769_v25, 4  ;;  %v1774_v34 = vrot.slane %v1772_v26, 5  ;;  %v278_v62 = vld [vmem:[%s4027_s30 + $0x84] sm:$0xf]  ;;  %v299_v25 = vld [vmem:[%s4027_s30 + $0x8c] sm:$0x1] }
  0x7f   : > { %v3594_v37 = vcombine.low %v980_v16, %v990_v35  ;;  %v1387_v38 = vsel %vm4051_vm2, %v1385_v30, %v1386_v21  ;;  %v1782_v39 = vshrl.u32 %v3469_v24, 16  ;;  %v3634_v41 = vcombine.low %v4299_v6, %v3469_v24  ;;  %v279_v16 = vld [vmem:[%s4027_s30 + $0x88] sm:$0xf]  ;;  %v262_v26 = vld [vmem:[%s4027_s30 + $0x24] sm:$0xf] }
  0x80   : > { %2476 = vrot.lane.b32.xlu1 %v3602_v33, %s3941_s8  ;;  %v3610_v43 = vcombine.low %v1384_v29, %v1387_v38  ;;  %v1577_v44 = vshrl.u32 %v3452_v31, 16  ;;  %v1580_v46 = vshll.u32 %v3452_v31, 16  ;;  %v1590_v1 = vshrl.u32 %v3453_v32, 16 }
  0x81   : > { %2460 = vrot.lane.b32.xlu0 %v3594_v37, %s3941_s8  ;;  %v3626_v47 = vcombine.low %v3452_v31, %v3453_v32  ;;  %v1775_v48 = vor.u32 %v1774_v34, %v1771_v36  ;;  %v1778_v7 = vshll.u32 %v3469_v24, 16  ;;  %v1784_v9 = vrot.slane %v1782_v39, 4  ;;  %v263_v31 = vld [vmem:[%s4027_s30 + $0x28] sm:$0xf]  ;;  %v291_v39 = vld [vmem:[%s4027_s30 + $0x2c] sm:$0x1] }
  0x82   : > { %v1579_v40 = vrot.slane %v1577_v44, 4  ;;  %v1582_v13 = vrot.slane %v1580_v46, 5  ;;  %v1788_v50 = vshll.u32 %v3490_v42, 16  ;;  %v1586_v51 = vshll.u32 %v3453_v32, 16 }
  0x83   : > { %v1776_v52 = vrot.slane %v1775_v48, 4  ;;  %v1780_v53 = vrot.slane %v1778_v7, 5  ;;  %v1592_v54 = vrot.slane %v1590_v1, 4  ;;  %v1596_v45 = vshll.u32 %v3482_v3, 16  ;;  %v702_v1 = vld [vmem:[%s4027_s30 + $0x84] sm:$0xe] }
  0x84   : > { %2556 = vrot.lane.b32.xlu1 %v3618_v28, %s3938_s5  ;;  %v1790_v55 = vrot.slane %v1788_v50, 5  ;;  %v1583_v56 = vor.u32 %v1582_v13, %v1579_v40  ;;  %v1588_v57 = vrot.slane %v1586_v51, 5  ;;  %v3522_v58 = vrot.slane %v3506_v49, 9 }
  0x85   : > { %2540 = vrot.lane.b32.xlu0 %v3610_v43, %s3938_s5  ;;  %v1781_v59 = vsel %vm4095_vm5, %v1776_v52, %v1780_v53  ;;  %v1785_v12 = vor.u32 %v1784_v9, %v1780_v53  ;;  %v1598_v60 = vrot.slane %v1596_v45, 5  ;;  %v2048_v61 = vrot.slane %v3469_v24, 5 }
  0x86   : > { %v1584_v63 = vrot.slane %v1583_v56, 4  ;;  %v1593_v0 = vor.u32 %v1592_v54, %v1588_v57  ;;  %v2051_v2 = vrot.slane %v3490_v42, 5  ;;  %v3514_v4 = vrot.slane %v3498_v20, 9  ;;  %v694_v54 = vld [vmem:[%s4027_s30 + $0x24] sm:$0xe] }
  0x87   : > { %v1786_v5 = vrot.slane %v1785_v12, 4  ;;  %v2049_v6 = vsel %vm4051_vm2, %v3522_v58, %v2048_v61  ;;  %v2050_v8 = vrot.slane %v2048_v61, 4  ;;  %v1992_v10 = vrot.slane %v3453_v32, 5 }
  0x88   : > { %2652 = vrot.lane.b32.xlu1 %v3634_v41, %s3942_s9  ;;  %v1589_v11 = vsel %vm4095_vm5, %v1584_v63, %v1588_v57  ;;  %v1594_v14 = vrot.slane %v1593_v0, 4  ;;  %v1995_v15 = vrot.slane %v3482_v3, 5  ;;  %v572_v18 = vshrl.u32 %v278_v62, 16  ;;  %v3390_v0 = vld [vmem:[%s4027_s30 + $0x90] sm:$0xf] }
  0x89   : > { %2636 = vrot.lane.b32.xlu0 %v3626_v47, %s3942_s9  ;;  %v1791_v21 = vsel %vm4095_vm5, %v1786_v5, %v1790_v55  ;;  %v2052_v22 = vsel %vm4051_vm2, %v2050_v8, %v2051_v2  ;;  %v1993_v23 = vsel %vm4051_vm2, %v3514_v4, %v1992_v10  ;;  %v1994_v24 = vrot.slane %v1992_v10, 4  ;;  %v3391_v10 = vld [vmem:[%s4027_s30 + $0x94] sm:$0xf] }
  0x8a   : > { %v3650_v27 = vcombine.low %v1781_v59, %v1791_v21  ;;  %v1599_v28 = vsel %vm4095_vm5, %v1594_v14, %v1598_v60  ;;  %v3666_v29 = vcombine.low %v2049_v6, %v2052_v22  ;;  %v574_v30 = vrot.slane %v572_v18, 4 }
  0x8b   : > { %v3642_v32 = vcombine.low %v1589_v11, %v1599_v28  ;;  %v1996_v33 = vsel %vm4051_vm2, %v1994_v24, %v1995_v15  ;;  %v575_v35 = vshll.u32 %v278_v62, 16  ;;  %v581_v36 = vshll.u32 %v279_v16, 16  ;;  %v4374_v11 = vld [vmem:[%s4027_s30 + $0x30] sm:$0xf] }
  0x8c   : > { %2732 = vrot.lane.b32.xlu1 %v3650_v27, %s3943_s10  ;;  %v3658_v34 = vcombine.low %v1993_v23, %v1996_v33  ;;  %v585_v37 = vshrl.u32 %v279_v16, 16  ;;  %v591_v38 = vshll.u32 %v299_v25, 16  ;;  %v380_v41 = vshrl.u32 %v262_v26, 16 }
  0x8d   : > { %2716 = vrot.lane.b32.xlu0 %v3642_v32, %s3943_s10  ;;  %v577_v42 = vrot.slane %v575_v35, 5  ;;  %v583_v43 = vrot.slane %v581_v36, 5  ;;  %v383_v44 = vshll.u32 %v262_v26, 16  ;;  %v389_v46 = vshll.u32 %v263_v31, 16  ;;  %v4392_v36 = vld [vmem:[%s4027_s30 + $0x38] sm:$0x1] }
  0x8e   : > { %v587_v3 = vrot.slane %v585_v37, 4  ;;  %v593_v47 = vrot.slane %v591_v38, 5  ;;  %v382_v48 = vrot.slane %v380_v41, 4  ;;  %v393_v7 = vshrl.u32 %v263_v31, 16 }
  0x8f   : > { %v578_v9 = vor.u32 %v577_v42, %v574_v30  ;;  %v385_v49 = vrot.slane %v383_v44, 5  ;;  %v391_v40 = vrot.slane %v389_v46, 5  ;;  %v399_v13 = vshll.u32 %v291_v39, 16  ;;  %v3411_v30 = vld [vmem:[%s4027_s30 + $0x98] sm:$0x1] }
  0x90   : > { %2812 = vrot.lane.b32.xlu1 %v3666_v29, %s3944_s11  ;;  %v588_v50 = vor.u32 %v587_v3, %v583_v43  ;;  %v395_v51 = vrot.slane %v393_v7, 4  ;;  %v3363_v52 = vrot.slane %v702_v1, 9  ;;  %v837_v53 = vrot.slane %v279_v16, 5  ;;  %v4366_v2 = vpop.permute.xlu1 %2392  ;;  %v3427_v42 = vld [vmem:[%s4027_s30 + $0x90] sm:$0xe] }
  0x91   : > { %2796 = vrot.lane.b32.xlu0 %v3658_v34, %s3944_s11  ;;  %v579_v45 = vrot.slane %v578_v9, 4  ;;  %v386_v20 = vor.u32 %v385_v49, %v382_v48  ;;  %v401_v55 = vrot.slane %v399_v13, 5  ;;  %v840_v56 = vrot.slane %v299_v25, 5  ;;  %v4383_v25 = vld [vmem:[%s4027_s30 + $0x34] sm:$0xf] }
  0x92   : > { %v589_v57 = vrot.slane %v588_v50, 4  ;;  %v396_v58 = vor.u32 %v395_v51, %v391_v40  ;;  %v838_v59 = vsel %vm4051_vm2, %v3363_v52, %v837_v53  ;;  %v839_v12 = vrot.slane %v837_v53, 4  ;;  %v4394_v34 = vpop.permute.xlu0 %2376  ;;  %v3419_v51 = vld [vmem:[%s4027_s30 + $0x30] sm:$0xe] }
  0x93   : > { %v584_v60 = vsel %vm4095_vm5, %v579_v45, %v583_v43  ;;  %v387_v61 = vrot.slane %v386_v20, 4  ;;  %v3355_v62 = vrot.slane %v694_v54, 9  ;;  %v781_v63 = vrot.slane %v263_v31, 5 }
  0x94   : > { %v594_v4 = vsel %vm4095_vm5, %v589_v57, %v593_v47  ;;  %v397_v5 = vrot.slane %v396_v58, 4  ;;  %v841_v6 = vsel %vm4051_vm2, %v839_v12, %v840_v56  ;;  %v784_v8 = vrot.slane %v291_v39, 5 }
  0x95   : > { %v3555_v14 = vcombine.low %v584_v60, %v594_v4  ;;  %v392_v15 = vsel %vm4095_vm5, %v387_v61, %v391_v40  ;;  %v3571_v16 = vcombine.low %v838_v59, %v841_v6  ;;  %v782_v18 = vsel %vm4051_vm2, %v3355_v62, %v781_v63  ;;  %v4413_v59 = vld [vmem:[%s4027_s30 + $0x9c] sm:$0xf] }
  0x96   : > { %v402_v21 = vsel %vm4095_vm5, %v397_v5, %v401_v55  ;;  %v783_v22 = vrot.slane %v781_v63, 4  ;;  %v1184_v23 = vshrl.u32 %v3390_v0, 16  ;;  %v1187_v24 = vshll.u32 %v3390_v0, 16 }
  0x97   : > { %2222 = vrot.lane.b32.xlu1 %v3555_v14, %s3940_s7  ;;  %v3547_v26 = vcombine.low %v392_v15, %v402_v21  ;;  %v1197_v27 = vshrl.u32 %v3391_v10, 16  ;;  %v3587_v28 = vcombine.low %v3390_v0, %v3391_v10  ;;  %v992_v29 = vshrl.u32 %v4374_v11, 16 }
  0x98   : > { %v785_v31 = vsel %vm4051_vm2, %v783_v22, %v784_v8  ;;  %v1186_v32 = vrot.slane %v1184_v23, 4  ;;  %v1189_v33 = vrot.slane %v1187_v24, 5  ;;  %v995_v35 = vshll.u32 %v4374_v11, 16  ;;  %v4415_v12 = vpop.permute.xlu0 %2536  ;;  %v3454_v23 = vld [vmem:[%s4027_s30 + $0x3c] sm:$0xf] }
  0x99   : > { %2206 = vrot.lane.b32.xlu0 %v3547_v26, %s3940_s7  ;;  %v3563_v37 = vcombine.low %v782_v18, %v785_v31  ;;  %v994_v38 = vrot.slane %v992_v29, 4  ;;  %v1005_v39 = vshrl.u32 %v4383_v25, 16  ;;  %v3579_v41 = vcombine.low %v4374_v11, %v4383_v25  ;;  %v4401_v43 = vpop.permute.xlu1 %2280  ;;  %v4428_v11 = vld [vmem:[%s4027_s30 + $0xa0] sm:$0xf] }
  0x9a   : > { %v997_v44 = vrot.slane %v995_v35, 5  ;;  %v1190_v46 = vor.u32 %v1189_v33, %v1186_v32  ;;  %v1193_v1 = vshll.u32 %v3391_v10, 16  ;;  %v1199_v3 = vrot.slane %v1197_v27, 4  ;;  %v4438_v24 = vld [vmem:[%s4027_s30 + $0x40] sm:$0xf] }
  0x9b   : > { %2302 = vrot.lane.b32.xlu1 %v3571_v16, %s3939_s6  ;;  %v1203_v47 = vshll.u32 %v3411_v30, 16  ;;  %v1001_v48 = vshll.u32 %v4383_v25, 16  ;;  %v1007_v7 = vrot.slane %v1005_v39, 4  ;;  %v1011_v9 = vshll.u32 %v4392_v36, 16  ;;  %v4450_v35 = vld [vmem:[%s4027_s30 + $0xa4] sm:$0x1] }
  0x9c   : > { %v1191_v49 = vrot.slane %v1190_v46, 4  ;;  %v1195_v40 = vrot.slane %v1193_v1, 5  ;;  %v998_v13 = vor.u32 %v997_v44, %v994_v38  ;;  %v3443_v50 = vrot.slane %v3427_v42, 9  ;;  %v4455_v42 = vld [vmem:[%s4027_s30 + $0x44] sm:$0x1] }
  0x9d   : > { %2286 = vrot.lane.b32.xlu0 %v3563_v37, %s3939_s6  ;;  %v1205_v52 = vrot.slane %v1203_v47, 5  ;;  %v1003_v53 = vrot.slane %v1001_v48, 5  ;;  %v1013_v54 = vrot.slane %v1011_v9, 5  ;;  %v1446_v45 = vrot.slane %v3391_v10, 5  ;;  %v4408_v20 = vpop.permute.xlu1 %2296 }
  0x9e   : > { %v1196_v55 = vsel %vm4095_vm5, %v1191_v49, %v1195_v40  ;;  %v1200_v56 = vor.u32 %v1199_v3, %v1195_v40  ;;  %v999_v57 = vrot.slane %v998_v13, 4  ;;  %v1449_v58 = vrot.slane %v3411_v30, 5 }
  0x9f   : > { %2398 = vrot.lane.b32.xlu1 %v3587_v28, %s3937_s4  ;;  %v1008_v60 = vor.u32 %v1007_v7, %v1003_v53  ;;  %v1447_v61 = vsel %vm4051_vm2, %v3443_v50, %v1446_v45  ;;  %v1448_v62 = vrot.slane %v1446_v45, 4  ;;  %v3435_v63 = vrot.slane %v3419_v51, 9  ;;  %v3829_v45 = vld [vmem:[%s4027_s30 + $0x4] sm:$0xf] }
  0xa0   : > { %v1201_v0 = vrot.slane %v1200_v56, 4  ;;  %v1004_v4 = vsel %vm4095_vm5, %v999_v57, %v1003_v53  ;;  %v1390_v5 = vrot.slane %v4383_v25, 5  ;;  %v1393_v6 = vrot.slane %v4392_v36, 5  ;;  %v3507_v57 = vld [vmem:[%s4027_s30 + $0x9c] sm:$0xe] }
  0xa1   : > { %2382 = vrot.lane.b32.xlu0 %v3579_v41, %s3937_s4  ;;  %v1009_v8 = vrot.slane %v1008_v60, 4  ;;  %v1450_v10 = vsel %vm4051_vm2, %v1448_v62, %v1449_v58  ;;  %v1793_v14 = vshrl.u32 %v4413_v59, 16  ;;  %v1796_v15 = vshll.u32 %v4413_v59, 16  ;;  %v4442_v29 = vpop.permute.xlu1 %2552  ;;  %v3499_v62 = vld [vmem:[%s4027_s30 + $0x3c] sm:$0xe] }
  0xa2   : > { %v1206_v16 = vsel %vm4095_vm5, %v1201_v0, %v1205_v52  ;;  %v3619_v18 = vcombine.low %v1447_v61, %v1450_v10  ;;  %v1391_v21 = vsel %vm4051_vm2, %v3435_v63, %v1390_v5  ;;  %v1392_v22 = vrot.slane %v1390_v5, 4 }
  0xa3   : > { %v3603_v25 = vcombine.low %v1196_v55, %v1206_v16  ;;  %v1014_v26 = vsel %vm4095_vm5, %v1009_v8, %v1013_v54  ;;  %v1795_v27 = vrot.slane %v1793_v14, 4  ;;  %v1798_v28 = vrot.slane %v1796_v15, 5  ;;  %v3830_v55 = vld [vmem:[%s4027_s30] sm:$0xf] }
  0xa4   : > { %v3595_v30 = vcombine.low %v1004_v4, %v1014_v26  ;;  %v1394_v31 = vsel %vm4051_vm2, %v1392_v22, %v1393_v6  ;;  %v1806_v32 = vshrl.u32 %v4428_v11, 16  ;;  %v3635_v33 = vcombine.low %v4413_v59, %v4428_v11  ;;  %v2201_v36 = vpop.permute.xlu0 %2200 }
  0xa5   : > { %2478 = vrot.lane.b32.xlu1 %v3603_v25, %s3941_s8  ;;  %v3611_v37 = vcombine.low %v1391_v21, %v1394_v31  ;;  %v1601_v38 = vshrl.u32 %v3454_v23, 16  ;;  %v1604_v39 = vshll.u32 %v3454_v23, 16  ;;  %v1614_v41 = vshrl.u32 %v4438_v24, 16  ;;  %v280_v25 = vld [vmem:[%s4027_s30 + $0x90] sm:$0xf] }
  0xa6   : > { %2462 = vrot.lane.b32.xlu0 %v3595_v30, %s3941_s8  ;;  %v3627_v44 = vcombine.low %v3454_v23, %v4438_v24  ;;  %v1799_v46 = vor.u32 %v1798_v28, %v1795_v27  ;;  %v1802_v1 = vshll.u32 %v4428_v11, 16  ;;  %v1808_v3 = vrot.slane %v1806_v32, 4  ;;  %v3831_v31 = vld [vmem:[%s4027_s30 + $0x64] sm:$0xf]  ;;  %v3832_v32 = vld [vmem:[%s4027_s30 + $0x60] sm:$0xf] }
  0xa7   : > { %v1603_v47 = vrot.slane %v1601_v38, 4  ;;  %v1606_v48 = vrot.slane %v1604_v39, 5  ;;  %v1812_v7 = vshll.u32 %v4450_v35, 16  ;;  %v1610_v9 = vshll.u32 %v4438_v24, 16  ;;  %v4507_v39 = vld [vmem:[%s4027_s30 + $0x98] sm:$0x1] }
  0xa8   : > { %v1800_v49 = vrot.slane %v1799_v46, 4  ;;  %v1804_v40 = vrot.slane %v1802_v1, 5  ;;  %v1616_v13 = vrot.slane %v1614_v41, 4  ;;  %v1620_v50 = vshll.u32 %v4455_v42, 16  ;;  %v2217_v51 = vpop.permute.xlu0 %2216 }
  0xa9   : > { %2558 = vrot.lane.b32.xlu1 %v3619_v18, %s3938_s5  ;;  %v1814_v52 = vrot.slane %v1812_v7, 5  ;;  %v1607_v53 = vor.u32 %v1606_v48, %v1603_v47  ;;  %v1612_v54 = vrot.slane %v1610_v9, 5  ;;  %v3528_v56 = vcombine.low %v3830_v55, %v3829_v45  ;;  %v4467_v58 = vpop.permute.xlu1 %2472 }
  0xaa   : > { %2542 = vrot.lane.b32.xlu0 %v3611_v37, %s3938_s5  ;;  %v1805_v59 = vsel %vm4095_vm5, %v1800_v49, %v1804_v40  ;;  %v1809_v60 = vor.u32 %v1808_v3, %v1804_v40  ;;  %v1622_v61 = vrot.slane %v1620_v50, 5  ;;  %v3523_v8 = vrot.slane %v3507_v57, 9  ;;  %v264_v3 = vld [vmem:[%s4027_s30 + $0x30] sm:$0xf]  ;;  %v265_v49 = vld [vmem:[%s4027_s30 + $0x34] sm:$0xf] }
  0xab   : > { %v1608_v63 = vrot.slane %v1607_v53, 4  ;;  %v1617_v0 = vor.u32 %v1616_v13, %v1612_v54  ;;  %v2827_v4 = vsel %vm2824_vm6, %v3528_v56, %v2201_v36  ;;  %v2055_v10 = vrot.slane %v4428_v11, 5 }
  0xac   : > { %v1810_v5 = vrot.slane %v1809_v60, 4  ;;  %v4476_v6 = vsel %vm2873_vm7, %v2827_v4, %v4401_v43  ;;  %v4479_v14 = vpop.permute.xlu0 %2456  ;;  %v2058_v18 = vrot.slane %v4450_v35, 5  ;;  %v3515_v21 = vrot.slane %v3499_v62, 9  ;;  %v4500_v35 = vld [vmem:[%s4027_s30 + $0x94] sm:$0xf] }
  0xad   : > { %2654 = vrot.lane.b32.xlu1 %v3635_v33, %s3942_s9  ;;  %v1613_v15 = vsel %vm4095_vm5, %v1608_v63, %v1612_v54  ;;  %v1618_v16 = vrot.slane %v1617_v0, 4  ;;  %v2056_v11 = vsel %vm4051_vm2, %v3523_v8, %v2055_v10  ;;  %v2057_v22 = vrot.slane %v2055_v10, 4  ;;  %v4492_v26 = vpop.permute.xlu1 %2648 }
  0xae   : > { %2638 = vrot.lane.b32.xlu0 %v3627_v44, %s3942_s9  ;;  %v1815_v43 = vsel %vm4095_vm5, %v1810_v5, %v1814_v52  ;;  %v1999_v23 = vrot.slane %v4438_v24, 5  ;;  %v2002_v30 = vrot.slane %v4455_v42, 5  ;;  %v3536_v33 = vcombine.low %v3832_v32, %v3831_v31  ;;  %v4524_v52 = vld [vmem:[%s4027_s30 + $0x38] sm:$0x1] }
  0xaf   : > { %v3651_v27 = vcombine.low %v1805_v59, %v1815_v43  ;;  %v1623_v28 = vsel %vm4095_vm5, %v1618_v16, %v1622_v61  ;;  %v2059_v37 = vsel %vm4051_vm2, %v2057_v22, %v2058_v18  ;;  %v596_v46 = vshrl.u32 %v280_v25, 16 }
  0xb0   : > { %v3643_v36 = vcombine.low %v1613_v15, %v1623_v28  ;;  %v2000_v24 = vsel %vm4051_vm2, %v3515_v21, %v1999_v23  ;;  %v2001_v38 = vrot.slane %v1999_v23, 4  ;;  %v4509_v41 = vpop.permute.xlu0 %2632  ;;  %v3667_v42 = vcombine.low %v2056_v11, %v2059_v37  ;;  %v703_v21 = vld [vmem:[%s4027_s30 + $0x90] sm:$0xe] }
  0xb1   : > { %2734 = vrot.lane.b32.xlu1 %v3651_v27, %s3943_s10  ;;  %v2851_v44 = vsel %vm2824_vm6, %v3536_v33, %v2217_v51  ;;  %v599_v1 = vshll.u32 %v280_v25, 16  ;;  %v605_v7 = vshll.u32 %v4500_v35, 16  ;;  %v609_v9 = vshrl.u32 %v4500_v35, 16  ;;  %v695_v25 = vld [vmem:[%s4027_s30 + $0x30] sm:$0xe] }
  0xb2   : > { %2718 = vrot.lane.b32.xlu0 %v3643_v36, %s3943_s10  ;;  %v2003_v47 = vsel %vm4051_vm2, %v2001_v38, %v2002_v30  ;;  %v2891_v48 = vsel %vm2873_vm7, %v2851_v44, %v4408_v20  ;;  %v598_v13 = vrot.slane %v596_v46, 4  ;;  %v615_v51 = vshll.u32 %v4507_v39, 16 }
  0xb3   : > { %v3659_v40 = vcombine.low %v2000_v24, %v2003_v47  ;;  %v601_v50 = vrot.slane %v599_v1, 5  ;;  %v607_v53 = vrot.slane %v605_v7, 5  ;;  %v611_v54 = vrot.slane %v609_v9, 4  ;;  %v4566_v47 = vld [vmem:[%s4027_s30 + $0xa0] sm:$0xf] }
  0xb4   : > { %v404_v45 = vshrl.u32 %v264_v3, 16  ;;  %v407_v55 = vshll.u32 %v264_v3, 16  ;;  %v4526_v56 = vpop.permute.xlu1 %2728  ;;  %v617_v57 = vrot.slane %v615_v51, 5  ;;  %v413_v59 = vshll.u32 %v265_v49, 16  ;;  %v3392_v3 = vld [vmem:[%s4027_s30 + $0x9c] sm:$0xf] }
  0xb5   : > { %2814 = vrot.lane.b32.xlu1 %v3667_v42, %s3944_s11  ;;  %v602_v20 = vor.u32 %v601_v50, %v598_v13  ;;  %v417_v60 = vshrl.u32 %v265_v49, 16  ;;  %v4529_v61 = vpop.permute.xlu0 %2712  ;;  %v612_v62 = vor.u32 %v611_v54, %v607_v53  ;;  %v423_v4 = vshll.u32 %v4524_v52, 16 }
  0xb6   : > { %2798 = vrot.lane.b32.xlu0 %v3659_v40, %s3944_s11  ;;  %v406_v63 = vrot.slane %v404_v45, 4  ;;  %v409_v0 = vrot.slane %v407_v55, 5  ;;  %v415_v8 = vrot.slane %v413_v59, 5  ;;  %v2924_v22 = vsel %vm2906_vm8, %v2891_v48, %v4366_v2  ;;  %v4576_v40 = vld [vmem:[%s4027_s30 + $0x40] sm:$0xf] }
  0xb7   : > { %v603_v5 = vrot.slane %v602_v20, 4  ;;  %v419_v10 = vrot.slane %v417_v60, 4  ;;  %v613_v15 = vrot.slane %v612_v62, 4  ;;  %v425_v18 = vrot.slane %v423_v4, 5  ;;  %v3412_v60 = vld [vmem:[%s4027_s30 + $0xa4] sm:$0x1] }
  0xb8   : > { %v410_v16 = vor.u32 %v409_v0, %v406_v63  ;;  %v2908_v23 = vsel %vm2906_vm8, %v4476_v6, %v4394_v34  ;;  %v4542_v27 = vpop.permute.xlu1 %2808  ;;  %v2957_v31 = vsel %vm2939_vm9, %v2924_v22, %v4467_v58  ;;  %v3364_v2 = vrot.slane %v703_v21, 9  ;;  %v4596_v0 = vld [vmem:[%s4027_s30 + $0x44] sm:$0x1] }
  0xb9   : > { %v608_v43 = vsel %vm4095_vm5, %v603_v5, %v607_v53  ;;  %v420_v11 = vor.u32 %v419_v10, %v415_v8  ;;  %v618_v28 = vsel %vm4095_vm5, %v613_v15, %v617_v57  ;;  %v2941_v32 = vsel %vm2939_vm9, %v2908_v23, %v4479_v14  ;;  %v4551_v34 = vpop.permute.xlu0 %2792 }
  0xba   : > { %v411_v30 = vrot.slane %v410_v16, 4  ;;  %v3556_v33 = vcombine.low %v608_v43, %v618_v28  ;;  %v844_v37 = vrot.slane %v4500_v35, 5  ;;  %v847_v24 = vrot.slane %v4507_v39, 5  ;;  %v3428_v16 = vld [vmem:[%s4027_s30 + $0x9c] sm:$0xe] }
  0xbb   : > { %v421_v36 = vrot.slane %v420_v11, 4  ;;  %v3356_v38 = vrot.slane %v695_v25, 9  ;;  %v788_v42 = vrot.slane %v265_v49, 5  ;;  %v791_v44 = vrot.slane %v4524_v52, 5  ;;  %v3376_v49 = vld [vmem:[%s4027_s30 + $0x3c] sm:$0xf] }
  0xbc   : > { %v416_v6 = vsel %vm4095_vm5, %v411_v30, %v415_v8  ;;  %2224 = vrot.lane.b32.xlu1 %v3556_v33, %s3940_s7  ;;  %v845_v14 = vsel %vm4051_vm2, %v3364_v2, %v844_v37  ;;  %v846_v35 = vrot.slane %v844_v37, 4  ;;  %v2990_v7 = vsel %vm2972_vm10, %v2957_v31, %v4442_v29 }
  0xbd   : > { %v426_v58 = vsel %vm4095_vm5, %v421_v36, %v425_v18  ;;  %v789_v1 = vsel %vm4051_vm2, %v3356_v38, %v788_v42  ;;  %v790_v39 = vrot.slane %v788_v42, 4  ;;  %v2974_v9 = vsel %vm2972_vm10, %v2941_v32, %v4415_v12 }
  0xbe   : > { %v3548_v46 = vcombine.low %v416_v6, %v426_v58  ;;  %v848_v48 = vsel %vm4051_vm2, %v846_v35, %v847_v24  ;;  %v3023_v52 = vsel %vm3005_vm11, %v2990_v7, %v4492_v26  ;;  %v3007_v29 = vsel %vm3005_vm11, %v2974_v9, %v4509_v41 }
  0xbf   : > { %v4578_v13 = vpop.permute.xlu1 %2218  ;;  %v3572_v50 = vcombine.low %v845_v14, %v848_v48  ;;  %v792_v51 = vsel %vm4051_vm2, %v790_v39, %v791_v44  ;;  %v1208_v53 = vshrl.u32 %v3392_v3, 16  ;;  %v1211_v54 = vshll.u32 %v3392_v3, 16 }
  0xc0   : > { %2208 = vrot.lane.b32.xlu0 %v3548_v46, %s3940_s7  ;;  %v3564_v12 = vcombine.low %v789_v1, %v792_v51  ;;  %v1221_v45 = vshrl.u32 %v4566_v47, 16  ;;  %v3588_v20 = vcombine.low %v3392_v3, %v4566_v47  ;;  %v1016_v57 = vshrl.u32 %v3376_v49, 16 }
  0xc1   : > { %v4588_v55 = vpop.permute.xlu0 %2202  ;;  %2304 = vrot.lane.b32.xlu1 %v3572_v50, %s3939_s6  ;;  %v1019_v59 = vshll.u32 %v3376_v49, 16  ;;  %v1029_v26 = vshrl.u32 %v4576_v40, 16  ;;  %v1210_v62 = vrot.slane %v1208_v53, 4  ;;  %v1213_v41 = vrot.slane %v1211_v54, 5 }
  0xc2   : > { %v3580_v63 = vcombine.low %v3376_v49, %v4576_v40  ;;  %v1018_v5 = vrot.slane %v1016_v57, 4  ;;  %v3056_v10 = vsel %vm3038_vm12, %v3023_v52, %v4526_v56  ;;  %v3040_v15 = vsel %vm3038_vm12, %v3007_v29, %v4529_v61  ;;  %v3420_v56 = vld [vmem:[%s4027_s30 + $0x3c] sm:$0xe]  ;;  %v4637_v29 = vld [vmem:[%s4027_s30 + $0xa8] sm:$0xf] }
  0xc3   : > { %v4598_v4 = vpop.permute.xlu1 %2298  ;;  %v1021_v8 = vrot.slane %v1019_v59, 5  ;;  %v1214_v18 = vor.u32 %v1213_v41, %v1210_v62  ;;  %v1217_v21 = vshll.u32 %v4566_v47, 16  ;;  %v1223_v43 = vrot.slane %v1221_v45, 4  ;;  %v3833_v45 = vld [vmem:[%s4027_s30 + $0x6c] sm:$0xf] }
  0xc4   : > { %2288 = vrot.lane.b32.xlu0 %v3564_v12, %s3939_s6  ;;  %v1227_v11 = vshll.u32 %v3412_v60, 16  ;;  %v1025_v25 = vshll.u32 %v4576_v40, 16  ;;  %v1031_v28 = vrot.slane %v1029_v26, 4  ;;  %v1035_v30 = vshll.u32 %v4596_v0, 16  ;;  %v4648_v59 = vld [vmem:[%s4027_s30 + $0xac] sm:$0xf] }
  0xc5   : > { %v4607_v22 = vpop.permute.xlu0 %2282  ;;  %2400 = vrot.lane.b32.xlu1 %v3588_v20, %s3937_s4  ;;  %v1022_v23 = vor.u32 %v1021_v8, %v1018_v5  ;;  %v1215_v31 = vrot.slane %v1214_v18, 4  ;;  %v1219_v32 = vrot.slane %v1217_v21, 5  ;;  %v3444_v33 = vrot.slane %v3428_v16, 9  ;;  %v3834_v20 = vld [vmem:[%s4027_s30 + $0x70] sm:$0xf] }
  0xc6   : > { %v1229_v61 = vrot.slane %v1227_v11, 5  ;;  %v1027_v37 = vrot.slane %v1025_v25, 5  ;;  %v1037_v6 = vrot.slane %v1035_v30, 5  ;;  %v1453_v24 = vrot.slane %v4566_v47, 5  ;;  %v3456_v26 = vld [vmem:[%s4027_s30 + $0x48] sm:$0xf] }
  0xc7   : > { %v4613_v36 = vpop.permute.xlu1 %2394  ;;  %v1023_v2 = vrot.slane %v1022_v23, 4  ;;  %v1220_v38 = vsel %vm4095_vm5, %v1215_v31, %v1219_v32  ;;  %v1224_v42 = vor.u32 %v1223_v43, %v1219_v32  ;;  %v1456_v58 = vrot.slane %v3412_v60, 5  ;;  %v3836_v5 = vld [vmem:[%s4027_s30 + $0x10] sm:$0xf] }
  0xc8   : > { %2384 = vrot.lane.b32.xlu0 %v3580_v63, %s3937_s4  ;;  %v3436_v14 = vrot.slane %v3420_v56, 9  ;;  %v1032_v46 = vor.u32 %v1031_v28, %v1027_v37  ;;  %v1454_v1 = vsel %vm4051_vm2, %v3444_v33, %v1453_v24  ;;  %v1455_v39 = vrot.slane %v1453_v24, 4  ;;  %v4673_v25 = vld [vmem:[%s4027_s30 + $0xb0] sm:$0x1] }
  0xc9   : > { %v4619_v35 = vpop.permute.xlu0 %2378  ;;  %v1028_v44 = vsel %vm4095_vm5, %v1023_v2, %v1027_v37  ;;  %v1225_v3 = vrot.slane %v1224_v42, 4  ;;  %v1397_v47 = vrot.slane %v4576_v40, 5  ;;  %v1400_v48 = vrot.slane %v4596_v0, 5  ;;  %v3835_v0 = vld [vmem:[%s4027_s30 + $0xc] sm:$0xf] }
  0xca   : > { %v1033_v7 = vrot.slane %v1032_v46, 4  ;;  %v1457_v9 = vsel %vm4051_vm2, %v1455_v39, %v1456_v58  ;;  %v3089_v49 = vsel %vm3071_vm13, %v3056_v10, %v4542_v27  ;;  %v3073_v54 = vsel %vm3071_vm13, %v3040_v15, %v4551_v34  ;;  %v4659_v10 = vld [vmem:[%s4027_s30 + $0x4c] sm:$0xf]  ;;  %v4679_v32 = vld [vmem:[%s4027_s30 + $0x50] sm:$0x1] }
  0xcb   : > { %v1230_v50 = vsel %vm4095_vm5, %v1225_v3, %v1229_v61  ;;  %v3620_v51 = vcombine.low %v1454_v1, %v1457_v9  ;;  %v1398_v40 = vsel %vm4051_vm2, %v3436_v14, %v1397_v47  ;;  %v1399_v52 = vrot.slane %v1397_v47, 4  ;;  %3699 = vmatprep.subr.msk.bf16.mxu0 %vm3111_vm14, %v3089_v49  ;;  %v3508_v46 = vld [vmem:[%s4027_s30 + $0xa8] sm:$0xe] }
  0xcc   : > { %v3604_v27 = vcombine.low %v1220_v38, %v1230_v50  ;;  %v1038_v53 = vsel %vm4095_vm5, %v1033_v7, %v1037_v6  ;;  %v3537_v57 = vcombine.low %v3833_v45, %v3834_v20  ;;  %v3115_v63 = vsel %vm3111_vm14, %v3073_v54, 0 }
  0xcd   : > { %v4639_v12 = vpop.permute.xlu1 %2474  ;;  %v3596_v62 = vcombine.low %v1028_v44, %v1038_v53  ;;  %v1401_v41 = vsel %vm4051_vm2, %v1399_v52, %v1400_v48  ;;  %v3529_v8 = vcombine.low %v3835_v0, %v3836_v5  ;;  %3682 = vmatpush3.bf16.xpose.msra.mxu0 %v3115_v63  ;;  %v1817_v16 = vshrl.u32 %v4637_v29, 16  ;;  %v3500_v48 = vld [vmem:[%s4027_s30 + $0x48] sm:$0xe] }
  0xce   : > { %v4651_v60 = vpop.permute.xlu0 %2458  ;;  %2480 = vrot.lane.b32.xlu1 %v3604_v27, %s3941_s8  ;;  %v3612_v34 = vcombine.low %v1398_v40, %v1401_v41  ;;  %v2854_v15 = vsel %vm2824_vm6, %v3537_v57, %v4578_v13  ;;  %v1820_v18 = vshll.u32 %v4637_v29, 16  ;;  %v1830_v43 = vshrl.u32 %v4648_v59, 16  ;;  %v282_v41 = vld [vmem:[%s4027_s30 + $0x9c] sm:$0xf] }
  0xcf   : > { %2464 = vrot.lane.b32.xlu0 %v3596_v62, %s3941_s8  ;;  %v2830_v21 = vsel %vm2824_vm6, %v3529_v8, %v4588_v55  ;;  %v3636_v11 = vcombine.low %v4637_v29, %v4648_v59  ;;  %v1625_v23 = vshrl.u32 %v3456_v26, 16  ;;  %v1819_v13 = vrot.slane %v1817_v16, 4 }
  0xd0   : > { %v1822_v30 = vrot.slane %v1820_v18, 5  ;;  %v1628_v56 = vshll.u32 %v3456_v26, 16  ;;  %v1638_v31 = vshrl.u32 %v4659_v10, 16  ;;  %v3628_v33 = vcombine.low %v3456_v26, %v4659_v10  ;;  %v4730_v18 = vld [vmem:[%s4027_s30 + $0xa0] sm:$0xf] }
  0xd1   : > { %v4675_v28 = vpop.permute.xlu1 %2554  ;;  %v1627_v55 = vrot.slane %v1625_v23, 4  ;;  %v2893_v2 = vsel %vm2873_vm7, %v2854_v15, %v4598_v4  ;;  %v2877_v37 = vsel %vm2873_vm7, %v2830_v21, %v4607_v22  ;;  %v1826_v38 = vshll.u32 %v4648_v59, 16 }
  0xd2   : > { %v4681_v61 = vpop.permute.xlu0 %2538  ;;  %2560 = vrot.lane.b32.xlu1 %v3620_v51, %s3938_s5  ;;  %v1630_v6 = vrot.slane %v1628_v56, 5  ;;  %v1823_v24 = vor.u32 %v1822_v30, %v1819_v13  ;;  %v1832_v42 = vrot.slane %v1830_v43, 4  ;;  %v1836_v58 = vshll.u32 %v4673_v25, 16 }
  0xd3   : > { %2544 = vrot.lane.b32.xlu0 %v3612_v34, %s3938_s5  ;;  %v1634_v14 = vshll.u32 %v4659_v10, 16  ;;  %v1640_v44 = vrot.slane %v1638_v31, 4  ;;  %v1644_v4 = vshll.u32 %v4679_v32, 16  ;;  %v1828_v39 = vrot.slane %v1826_v38, 5  ;;  %v267_v31 = vld [vmem:[%s4027_s30 + $0x40] sm:$0xf] }
  0xd4   : > { %v1824_v22 = vrot.slane %v1823_v24, 4  ;;  %v1631_v3 = vor.u32 %v1630_v6, %v1627_v55  ;;  %v2926_v47 = vsel %vm2906_vm8, %v2893_v2, %v4613_v36  ;;  %v1838_v9 = vrot.slane %v1836_v58, 5  ;;  %v293_v38 = vld [vmem:[%s4027_s30 + $0x44] sm:$0x1] }
  0xd5   : > { %v4695_v1 = vpop.permute.xlu1 %2650  ;;  %v1636_v49 = vrot.slane %v1634_v14, 5  ;;  %v1646_v50 = vrot.slane %v1644_v4, 5  ;;  %v2910_v51 = vsel %vm2906_vm8, %v2877_v37, %v4619_v35  ;;  %v1833_v52 = vor.u32 %v1832_v42, %v1828_v39 }
  0xd6   : > { %v4700_v7 = vpop.permute.xlu0 %2634  ;;  %2656 = vrot.lane.b32.xlu1 %v3636_v11, %s3942_s9  ;;  %v1829_v40 = vsel %vm4095_vm5, %v1824_v22, %v1828_v39  ;;  %v1632_v29 = vrot.slane %v1631_v3, 4  ;;  %v3524_v27 = vrot.slane %v3508_v46, 9  ;;  %v2062_v53 = vrot.slane %v4648_v59, 5  ;;  %v4737_v11 = vld [vmem:[%s4027_s30 + $0xa4] sm:$0x1] }
  0xd7   : > { %2640 = vrot.lane.b32.xlu0 %v3628_v33, %s3942_s9  ;;  %v1641_v36 = vor.u32 %v1640_v44, %v1636_v49  ;;  %v2065_v54 = vrot.slane %v4673_v25, 5  ;;  %v3516_v45 = vrot.slane %v3500_v48, 9  ;;  %v1834_v35 = vrot.slane %v1833_v52, 4  ;;  %v266_v25 = vld [vmem:[%s4027_s30 + $0x3c] sm:$0xf] }
  0xd8   : > { %v1637_v57 = vsel %vm4095_vm5, %v1632_v29, %v1636_v49  ;;  %v2006_v26 = vrot.slane %v4659_v10, 5  ;;  %v2009_v62 = vrot.slane %v4679_v32, 5  ;;  %v2063_v0 = vsel %vm4051_vm2, %v3524_v27, %v2062_v53 }
  0xd9   : > { %v4710_v20 = vpop.permute.xlu1 %2730  ;;  %v1642_v59 = vrot.slane %v1641_v36, 4  ;;  %v2064_v5 = vrot.slane %v2062_v53, 4  ;;  %v2959_v8 = vsel %vm2939_vm9, %v2926_v47, %v4639_v12  ;;  %v1839_v34 = vsel %vm4095_vm5, %v1834_v35, %v1838_v9  ;;  %v704_v9 = vld [vmem:[%s4027_s30 + $0x9c] sm:$0xe] }
  0xda   : > { %v4717_v63 = vpop.permute.xlu0 %2714  ;;  %v2007_v10 = vsel %vm4051_vm2, %v3516_v45, %v2006_v26  ;;  %v2008_v15 = vrot.slane %v2006_v26, 4  ;;  %v2943_v16 = vsel %vm2939_vm9, %v2910_v51, %v4651_v60  ;;  %v3652_v21 = vcombine.low %v1829_v40, %v1839_v34  ;;  %v696_v53 = vld [vmem:[%s4027_s30 + $0x3c] sm:$0xe] }
  0xdb   : > { %v1647_v43 = vsel %vm4095_vm5, %v1642_v59, %v1646_v50  ;;  %v2066_v12 = vsel %vm4051_vm2, %v2064_v5, %v2065_v54  ;;  %v620_v23 = vshrl.u32 %v282_v41, 16  ;;  %v623_v60 = vshll.u32 %v282_v41, 16 }
  0xdc   : > { %v3644_v13 = vcombine.low %v1637_v57, %v1647_v43  ;;  %v3668_v30 = vcombine.low %v2063_v0, %v2066_v12  ;;  %v2010_v56 = vsel %vm4051_vm2, %v2008_v15, %v2009_v62  ;;  %2736 = vrot.lane.b32.xlu1 %v3652_v21, %s3943_s10  ;;  %v629_v2 = vshll.u32 %v4730_v18, 16  ;;  %v3394_v21 = vld [vmem:[%s4027_s30 + $0xa8] sm:$0xf] }
  0xdd   : > { %v4743_v32 = vpop.permute.xlu1 %2810  ;;  %v3660_v55 = vcombine.low %v2007_v10, %v2010_v56  ;;  %v622_v33 = vrot.slane %v620_v23, 4  ;;  %v633_v37 = vshrl.u32 %v4730_v18, 16  ;;  %v625_v6 = vrot.slane %v623_v60, 5 }
  0xde   : > { %2720 = vrot.lane.b32.xlu0 %v3644_v13, %s3943_s10  ;;  %v639_v24 = vshll.u32 %v4737_v11, 16  ;;  %v428_v42 = vshrl.u32 %v266_v25, 16  ;;  %v431_v58 = vshll.u32 %v266_v25, 16  ;;  %v4751_v14 = vpop.permute.xlu0 %2794  ;;  %v631_v44 = vrot.slane %v629_v2, 5  ;;  %v4783_v13 = vld [vmem:[%s4027_s30 + $0xac] sm:$0xf] }
  0xdf   : > { %v635_v4 = vrot.slane %v633_v37, 4  ;;  %v437_v46 = vshll.u32 %v267_v31, 16  ;;  %v441_v22 = vshrl.u32 %v267_v31, 16  ;;  %v626_v39 = vor.u32 %v625_v6, %v622_v33  ;;  %v4794_v33 = vld [vmem:[%s4027_s30 + $0x4c] sm:$0xf] }
  0xe0   : > { %v641_v3 = vrot.slane %v639_v24, 5  ;;  %v430_v47 = vrot.slane %v428_v42, 4  ;;  %v433_v48 = vrot.slane %v431_v58, 5  ;;  %2816 = vrot.lane.b32.xlu1 %v3668_v30, %s3944_s11  ;;  %v447_v40 = vshll.u32 %v293_v38, 16  ;;  %v3378_v30 = vld [vmem:[%s4027_s30 + $0x48] sm:$0xf] }
  0xe1   : > { %v636_v49 = vor.u32 %v635_v4, %v631_v44  ;;  %v439_v50 = vrot.slane %v437_v46, 5  ;;  %v443_v51 = vrot.slane %v441_v22, 4  ;;  %v627_v52 = vrot.slane %v626_v39, 4 }
  0xe2   : > { %2800 = vrot.lane.b32.xlu0 %v3660_v55, %s3944_s11  ;;  %v434_v29 = vor.u32 %v433_v48, %v430_v47  ;;  %v2992_v27 = vsel %vm2972_vm10, %v2959_v8, %v4675_v28  ;;  %v2976_v36 = vsel %vm2972_vm10, %v2943_v16, %v4681_v61  ;;  %v449_v57 = vrot.slane %v447_v40, 5  ;;  %v4810_v47 = vld [vmem:[%s4027_s30 + $0x50] sm:$0x1] }
  0xe3   : > { %v637_v45 = vrot.slane %v636_v49, 4  ;;  %v444_v35 = vor.u32 %v443_v51, %v439_v50  ;;  %v3365_v26 = vrot.slane %v704_v9, 9  ;;  %v632_v62 = vsel %vm4095_vm5, %v627_v52, %v631_v44 }
  0xe4   : > { %v4761_v54 = vpop.permute.xlu1 %2220  ;;  %v435_v41 = vrot.slane %v434_v29, 4  ;;  %v851_v59 = vrot.slane %v4730_v18, 5  ;;  %v854_v0 = vrot.slane %v4737_v11, 5  ;;  %v3357_v8 = vrot.slane %v696_v53, 9 }
  0xe5   : > { %v642_v61 = vsel %vm4095_vm5, %v637_v45, %v641_v3  ;;  %v445_v5 = vrot.slane %v444_v35, 4  ;;  %v795_v34 = vrot.slane %v267_v31, 5  ;;  %v798_v25 = vrot.slane %v293_v38, 5  ;;  %v3429_v35 = vld [vmem:[%s4027_s30 + $0xa8] sm:$0xe] }
  0xe6   : > { %v4767_v28 = vpop.permute.xlu0 %2204  ;;  %v3557_v10 = vcombine.low %v632_v62, %v642_v61  ;;  %v440_v15 = vsel %vm4095_vm5, %v435_v41, %v439_v50  ;;  %v852_v16 = vsel %vm4051_vm2, %v3365_v26, %v851_v59  ;;  %v853_v18 = vrot.slane %v851_v59, 4  ;;  %v3421_v41 = vld [vmem:[%s4027_s30 + $0x48] sm:$0xe] }
  0xe7   : > { %v450_v12 = vsel %vm4095_vm5, %v445_v5, %v449_v57  ;;  %v796_v11 = vsel %vm4051_vm2, %v3357_v8, %v795_v34  ;;  %v797_v23 = vrot.slane %v795_v34, 4  ;;  %v3025_v31 = vsel %vm3005_vm11, %v2992_v27, %v4695_v1 }
  0xe8   : > { %v4776_v43 = vpop.permute.xlu1 %2300  ;;  %2226 = vrot.lane.b32.xlu1 %v3557_v10, %s3940_s7  ;;  %v3549_v56 = vcombine.low %v440_v15, %v450_v12  ;;  %v855_v60 = vsel %vm4051_vm2, %v853_v18, %v854_v0  ;;  %v3009_v55 = vsel %vm3005_vm11, %v2976_v36, %v4700_v7  ;;  %v1232_v24 = vshrl.u32 %v3394_v21, 16  ;;  %v4804_v7 = vld [vmem:[%s4027_s30 + $0xb0] sm:$0x1] }
  0xe9   : > { %v3573_v37 = vcombine.low %v852_v16, %v855_v60  ;;  %v799_v6 = vsel %vm4051_vm2, %v797_v23, %v798_v25  ;;  %v1235_v38 = vshll.u32 %v3394_v21, 16  ;;  %v1245_v58 = vshrl.u32 %v4783_v13, 16 }
  0xea   : > { %v4796_v2 = vpop.permute.xlu0 %2284  ;;  %2210 = vrot.lane.b32.xlu0 %v3549_v56, %s3940_s7  ;;  %v3565_v42 = vcombine.low %v796_v11, %v799_v6  ;;  %v3589_v1 = vcombine.low %v3394_v21, %v4783_v13  ;;  %v1040_v44 = vshrl.u32 %v3378_v30, 16  ;;  %v1234_v46 = vrot.slane %v1232_v24, 4  ;;  %v3837_v24 = vld [vmem:[%s4027_s30 + $0x78] sm:$0xf] }
  0xeb   : > { %v1237_v22 = vrot.slane %v1235_v38, 5  ;;  %v1043_v39 = vshll.u32 %v3378_v30, 16  ;;  %v1053_v3 = vshrl.u32 %v4794_v33, 16  ;;  %v3581_v9 = vcombine.low %v3378_v30, %v4794_v33  ;;  %v3838_v38 = vld [vmem:[%s4027_s30 + $0x7c] sm:$0xf] }
  0xec   : > { %v4806_v4 = vpop.permute.xlu1 %2396  ;;  %2306 = vrot.lane.b32.xlu1 %v3573_v37, %s3939_s6  ;;  %v1042_v48 = vrot.slane %v1040_v44, 4  ;;  %v3058_v49 = vsel %vm3038_vm12, %v3025_v31, %v4710_v20  ;;  %v3042_v50 = vsel %vm3038_vm12, %v3009_v55, %v4717_v63  ;;  %v1241_v29 = vshll.u32 %v4783_v13, 16 }
  0xed   : > { %v1045_v40 = vrot.slane %v1043_v39, 5  ;;  %v1238_v52 = vor.u32 %v1237_v22, %v1234_v46  ;;  %v1247_v27 = vrot.slane %v1245_v58, 4  ;;  %v1251_v36 = vshll.u32 %v4804_v7, 16  ;;  %v3474_v58 = vld [vmem:[%s4027_s30 + $0xb4] sm:$0xf] }
  0xee   : > { %v4818_v51 = vpop.permute.xlu0 %2380  ;;  %2290 = vrot.lane.b32.xlu0 %v3565_v42, %s3939_s6  ;;  %v1049_v53 = vshll.u32 %v4794_v33, 16  ;;  %v1055_v45 = vrot.slane %v1053_v3, 4  ;;  %v1059_v20 = vshll.u32 %v4810_v47, 16  ;;  %v1243_v63 = vrot.slane %v1241_v29, 5  ;;  %v3839_v22 = vld [vmem:[%s4027_s30 + $0x18] sm:$0xf] }
  0xef   : > { %v1239_v57 = vrot.slane %v1238_v52, 4  ;;  %v1046_v26 = vor.u32 %v1045_v40, %v1042_v48  ;;  %v3091_v62 = vsel %vm3071_vm13, %v3058_v49, %v4743_v32  ;;  %v1253_v59 = vrot.slane %v1251_v36, 5  ;;  %v3840_v39 = vld [vmem:[%s4027_s30 + $0x1c] sm:$0xf]  ;;  %v3458_v48 = vld [vmem:[%s4027_s30 + $0x54] sm:$0xf] }
  0xf0   : > { %2402 = vrot.lane.b32.xlu1 %v3589_v1, %s3937_s4  ;;  %v1051_v0 = vrot.slane %v1049_v53, 5  ;;  %v1061_v61 = vrot.slane %v1059_v20, 5  ;;  %v3075_v5 = vsel %vm3071_vm13, %v3042_v50, %v4751_v14  ;;  %3700 = vmatprep.subr.msk.bf16.mxu0 %vm3111_vm14, %v3091_v62  ;;  %v1248_v10 = vor.u32 %v1247_v27, %v1243_v63  ;;  %v4875_v52 = vld [vmem:[%s4027_s30 + $0x58] sm:$0xf] }
  0xf1   : > { %v1244_v34 = vsel %vm4095_vm5, %v1239_v57, %v1243_v63  ;;  %v1047_v15 = vrot.slane %v1046_v26, 4  ;;  %v3445_v16 = vrot.slane %v3429_v35, 9  ;;  %v1460_v21 = vrot.slane %v4783_v13, 5  ;;  %v3493_v63 = vld [vmem:[%s4027_s30 + $0xbc] sm:$0x1] }
  0xf2   : > { %v4833_v8 = vpop.permute.xlu1 %2476  ;;  %2386 = vrot.lane.b32.xlu0 %v3581_v9, %s3937_s4  ;;  %v1056_v18 = vor.u32 %v1055_v45, %v1051_v0  ;;  %v1463_v14 = vrot.slane %v4804_v7, 5  ;;  %v3437_v12 = vrot.slane %v3421_v41, 9  ;;  %v1249_v11 = vrot.slane %v1248_v10, 4 }
  0xf3   : > { %v4837_v32 = vpop.permute.xlu0 %2460  ;;  %v1052_v23 = vsel %vm4095_vm5, %v1047_v15, %v1051_v0  ;;  %v1404_v25 = vrot.slane %v4794_v33, 5  ;;  %v1407_v30 = vrot.slane %v4810_v47, 5  ;;  %v1461_v60 = vsel %vm4051_vm2, %v3445_v16, %v1460_v21  ;;  %v4867_v47 = vld [vmem:[%s4027_s30 + $0xb8] sm:$0xf]  ;;  %v3485_v0 = vld [vmem:[%s4027_s30 + $0x5c] sm:$0x1] }
  0xf4   : > { %v1057_v56 = vrot.slane %v1056_v18, 4  ;;  %v1462_v13 = vrot.slane %v1460_v21, 4  ;;  %v3117_v31 = vsel %vm3111_vm14, %v3075_v5, 0  ;;  %v1254_v37 = vsel %vm4095_vm5, %v1249_v11, %v1253_v59 }
  0xf5   : > { %v1405_v33 = vsel %vm4051_vm2, %v3437_v12, %v1404_v25  ;;  %v1406_v6 = vrot.slane %v1404_v25, 4  ;;  %3684 = vmatpush3.bf16.xpose.msra.mxu0 %v3117_v31  ;;  %v3538_v42 = vcombine.low %v3837_v24, %v3838_v38  ;;  %v3605_v44 = vcombine.low %v1244_v34, %v1254_v37  ;;  %v3509_v25 = vld [vmem:[%s4027_s30 + $0xb4] sm:$0xe] }
  0xf6   : > { %v4849_v55 = vpop.permute.xlu1 %2556  ;;  %v1062_v7 = vsel %vm4095_vm5, %v1057_v56, %v1061_v61  ;;  %v1464_v46 = vsel %vm4051_vm2, %v1462_v13, %v1463_v14  ;;  %v3530_v3 = vcombine.low %v3839_v22, %v3840_v39  ;;  %v1841_v36 = vshrl.u32 %v3474_v58, 16  ;;  %v3501_v31 = vld [vmem:[%s4027_s30 + $0x54] sm:$0xe] }
  0xf7   : > { %v4858_v1 = vpop.permute.xlu0 %2540  ;;  %v3597_v9 = vcombine.low %v1052_v23, %v1062_v7  ;;  %v3621_v49 = vcombine.low %v1461_v60, %v1464_v46  ;;  %v1408_v50 = vsel %vm4051_vm2, %v1406_v6, %v1407_v30  ;;  %v2857_v40 = vsel %vm2824_vm6, %v3538_v42, %v4761_v54  ;;  %2482 = vrot.lane.b32.xlu1 %v3605_v44, %s3941_s8 }
  0xf8   : > { %v3613_v29 = vcombine.low %v1405_v33, %v1408_v50  ;;  %v2833_v27 = vsel %vm2824_vm6, %v3530_v3, %v4767_v28  ;;  %v1844_v53 = vshll.u32 %v3474_v58, 16  ;;  %v1854_v20 = vshrl.u32 %v4867_v47, 16 }
  0xf9   : > { %2466 = vrot.lane.b32.xlu0 %v3597_v9, %s3941_s8  ;;  %v3637_v35 = vcombine.low %v3474_v58, %v4867_v47  ;;  %v1649_v54 = vshrl.u32 %v3458_v48, 16  ;;  %v1652_v57 = vshll.u32 %v3458_v48, 16  ;;  %v1843_v62 = vrot.slane %v1841_v36, 4 }
  0xfa   : > { %v4880_v45 = vpop.permute.xlu1 %2652  ;;  %v1846_v41 = vrot.slane %v1844_v53, 5  ;;  %v1662_v59 = vshrl.u32 %v4875_v52, 16  ;;  %v3629_v28 = vcombine.low %v3458_v48, %v4875_v52  ;;  %v2895_v34 = vsel %vm2873_vm7, %v2857_v40, %v4776_v43 }
  0xfb   : > { %v4886_v26 = vpop.permute.xlu0 %2636  ;;  %v1651_v61 = vrot.slane %v1649_v54, 4  ;;  %v1654_v5 = vrot.slane %v1652_v57, 5  ;;  %v2879_v10 = vsel %vm2873_vm7, %v2833_v27, %v4796_v2  ;;  %2562 = vrot.lane.b32.xlu1 %v3621_v49, %s3938_s5  ;;  %v1850_v16 = vshll.u32 %v4867_v47, 16  ;;  %v4927_v27 = vld [vmem:[%s4027_s30 + $0xac] sm:$0xf] }
  0xfc   : > { %v1847_v15 = vor.u32 %v1846_v41, %v1843_v62  ;;  %v1856_v18 = vrot.slane %v1854_v20, 4  ;;  %v1860_v21 = vshll.u32 %v3493_v63, 16  ;;  %v1658_v11 = vshll.u32 %v4875_v52, 16  ;;  %v4938_v54 = vld [vmem:[%s4027_s30 + $0xb0] sm:$0x1] }
  0xfd   : > { %2546 = vrot.lane.b32.xlu0 %v3613_v29, %s3938_s5  ;;  %v1655_v12 = vor.u32 %v1654_v5, %v1651_v61  ;;  %v1664_v23 = vrot.slane %v1662_v59, 4  ;;  %v1668_v43 = vshll.u32 %v3485_v0, 16  ;;  %v1852_v56 = vrot.slane %v1850_v16, 5  ;;  %v268_v62 = vld [vmem:[%s4027_s30 + $0x48] sm:$0xf] }
  0xfe   : > { %v4897_v14 = vpop.permute.xlu1 %2732  ;;  %v1848_v2 = vrot.slane %v1847_v15, 4  ;;  %v1862_v60 = vrot.slane %v1860_v21, 5  ;;  %v2928_v13 = vsel %vm2906_vm8, %v2895_v34, %v4806_v4  ;;  %v1660_v33 = vrot.slane %v1658_v11, 5  ;;  %v269_v61 = vld [vmem:[%s4027_s30 + $0x4c] sm:$0xf] }
  0xff   : > { %v4902_v30 = vpop.permute.xlu0 %2716  ;;  %v1656_v37 = vrot.slane %v1655_v12, 4  ;;  %v1670_v6 = vrot.slane %v1668_v43, 5  ;;  %v2912_v24 = vsel %vm2906_vm8, %v2879_v10, %v4818_v51  ;;  %2658 = vrot.lane.b32.xlu1 %v3637_v35, %s3942_s9  ;;  %v1857_v42 = vor.u32 %v1856_v18, %v1852_v56  ;;  %v4951_v16 = vld [vmem:[%s4027_s30 + $0x50] sm:$0x1] }
 0x100   : > { %v1853_v38 = vsel %vm4095_vm5, %v1848_v2, %v1852_v56  ;;  %v3525_v58 = vrot.slane %v3509_v25, 9  ;;  %v2069_v44 = vrot.slane %v4867_v47, 5  ;;  %v1665_v7 = vor.u32 %v1664_v23, %v1660_v33  ;;  %v284_v47 = vld [vmem:[%s4027_s30 + $0xa8] sm:$0xf] }
 0x101   : > { %2642 = vrot.lane.b32.xlu0 %v3629_v28, %s3942_s9  ;;  %v1661_v4 = vsel %vm4095_vm5, %v1656_v37, %v1660_v33  ;;  %v2072_v46 = vrot.slane %v3493_v63, 5  ;;  %v3517_v22 = vrot.slane %v3501_v31, 9  ;;  %v1858_v39 = vrot.slane %v1857_v42, 4 }
 0x102   : > { %v4916_v51 = vpop.permute.xlu1 %2812  ;;  %v2070_v3 = vsel %vm4051_vm2, %v3525_v58, %v2069_v44  ;;  %v2071_v48 = vrot.slane %v2069_v44, 4  ;;  %v2013_v9 = vrot.slane %v4875_v52, 5  ;;  %v1666_v49 = vrot.slane %v1665_v7, 4  ;;  %v697_v44 = vld [vmem:[%s4027_s30 + $0x48] sm:$0xe] }
 0x103   : > { %v2016_v50 = vrot.slane %v3485_v0, 5  ;;  %v2961_v40 = vsel %vm2939_vm9, %v2928_v13, %v4833_v8  ;;  %v2945_v29 = vsel %vm2939_vm9, %v2912_v24, %v4837_v32  ;;  %v4929_v36 = vpop.permute.xlu0 %2796  ;;  %v1863_v53 = vsel %vm4095_vm5, %v1858_v39, %v1862_v60 }
 0x104   : > { %v2073_v52 = vsel %vm4051_vm2, %v2071_v48, %v2072_v46  ;;  %v2014_v20 = vsel %vm4051_vm2, %v3517_v22, %v2013_v9  ;;  %v2015_v35 = vrot.slane %v2013_v9, 4  ;;  %v3653_v8 = vcombine.low %v1853_v38, %v1863_v53 }
 0x105   : > { %v1671_v32 = vsel %vm4095_vm5, %v1666_v49, %v1670_v6  ;;  %v3669_v57 = vcombine.low %v2070_v3, %v2073_v52  ;;  %v644_v63 = vshrl.u32 %v284_v47, 16  ;;  %v647_v28 = vshll.u32 %v284_v47, 16  ;;  %v705_v6 = vld [vmem:[%s4027_s30 + $0xa8] sm:$0xe] }
 0x106   : > { %v3645_v41 = vcombine.low %v1661_v4, %v1671_v32  ;;  %v2017_v59 = vsel %vm4051_vm2, %v2015_v35, %v2016_v50  ;;  %v653_v0 = vshll.u32 %v4927_v27, 16  ;;  %2738 = vrot.lane.b32.xlu1 %v3653_v8, %s3943_s10  ;;  %v657_v10 = vshrl.u32 %v4927_v27, 16 }
 0x107   : > { %v3661_v5 = vcombine.low %v2014_v20, %v2017_v59  ;;  %v646_v34 = vrot.slane %v644_v63, 4  ;;  %v663_v15 = vshll.u32 %v4938_v54, 16  ;;  %v649_v21 = vrot.slane %v647_v28, 5  ;;  %v4986_v63 = vld [vmem:[%s4027_s30 + $0xb8] sm:$0xf] }
 0x108   : > { %2722 = vrot.lane.b32.xlu0 %v3645_v41, %s3943_s10  ;;  %v655_v12 = vrot.slane %v653_v0, 5  ;;  %v861_v11 = vrot.slane %v4938_v54, 5  ;;  %v452_v23 = vshrl.u32 %v268_v62, 16  ;;  %v659_v43 = vrot.slane %v657_v10, 4  ;;  %v3380_v10 = vld [vmem:[%s4027_s30 + $0x54] sm:$0xf] }
 0x109   : > { %v4953_v18 = vpop.permute.xlu1 %2222  ;;  %v665_v25 = vrot.slane %v663_v15, 5  ;;  %v455_v2 = vshll.u32 %v268_v62, 16  ;;  %v461_v56 = vshll.u32 %v269_v61, 16  ;;  %v650_v13 = vor.u32 %v649_v21, %v646_v34  ;;  %v5003_v15 = vld [vmem:[%s4027_s30 + $0x58] sm:$0xf] }
 0x10a   : > { %v454_v31 = vrot.slane %v452_v23, 4  ;;  %v465_v37 = vshrl.u32 %v269_v61, 16  ;;  %v471_v33 = vshll.u32 %v4951_v16, 16  ;;  %2818 = vrot.lane.b32.xlu1 %v3669_v57, %s3944_s11  ;;  %v660_v24 = vor.u32 %v659_v43, %v655_v12 }
 0x10b   : > { %v4957_v60 = vpop.permute.xlu0 %2206  ;;  %v457_v38 = vrot.slane %v455_v2, 5  ;;  %v463_v42 = vrot.slane %v461_v56, 5  ;;  %v805_v58 = vrot.slane %v4951_v16, 5  ;;  %v651_v7 = vrot.slane %v650_v13, 4  ;;  %v3414_v56 = vld [vmem:[%s4027_s30 + $0xbc] sm:$0x1] }
 0x10c   : > { %2802 = vrot.lane.b32.xlu0 %v3661_v5, %s3944_s11  ;;  %v467_v46 = vrot.slane %v465_v37, 4  ;;  %v473_v22 = vrot.slane %v471_v33, 5  ;;  %v2994_v39 = vsel %vm2972_vm10, %v2961_v40, %v4849_v55  ;;  %v661_v3 = vrot.slane %v660_v24, 4 }
 0x10d   : > { %v4964_v4 = vpop.permute.xlu1 %2302  ;;  %v458_v48 = vor.u32 %v457_v38, %v454_v31  ;;  %v2978_v9 = vsel %vm2972_vm10, %v2945_v29, %v4858_v1  ;;  %v3366_v47 = vrot.slane %v705_v6, 9  ;;  %v656_v50 = vsel %vm4095_vm5, %v651_v7, %v655_v12  ;;  %v3396_v1 = vld [vmem:[%s4027_s30 + $0xb4] sm:$0xf] }
 0x10e   : > { %v468_v53 = vor.u32 %v467_v46, %v463_v42  ;;  %v858_v52 = vrot.slane %v4927_v27, 5  ;;  %v3358_v20 = vrot.slane %v697_v44, 9  ;;  %v666_v35 = vsel %vm4095_vm5, %v661_v3, %v665_v25 }
 0x10f   : > { %v4971_v49 = vpop.permute.xlu0 %2286  ;;  %v459_v55 = vrot.slane %v458_v48, 4  ;;  %v802_v40 = vrot.slane %v269_v61, 5  ;;  %v3027_v54 = vsel %vm3005_vm11, %v2994_v39, %v4880_v45  ;;  %v3558_v8 = vcombine.low %v656_v50, %v666_v35 }
 0x110   : > { %v469_v32 = vrot.slane %v468_v53, 4  ;;  %v859_v57 = vsel %vm4051_vm2, %v3366_v47, %v858_v52  ;;  %v860_v27 = vrot.slane %v858_v52, 4  ;;  %v3011_v59 = vsel %vm3005_vm11, %v2978_v9, %v4886_v26  ;;  %v3430_v47 = vld [vmem:[%s4027_s30 + $0xb4] sm:$0xe] }
 0x111   : > { %v4981_v29 = vpop.permute.xlu1 %2398  ;;  %v464_v62 = vsel %vm4095_vm5, %v459_v55, %v463_v42  ;;  %v803_v41 = vsel %vm4051_vm2, %v3358_v20, %v802_v40  ;;  %v804_v45 = vrot.slane %v802_v40, 4  ;;  %2228 = vrot.lane.b32.xlu1 %v3558_v8, %s3940_s7  ;;  %v1256_v5 = vshrl.u32 %v3396_v1, 16  ;;  %v3422_v20 = vld [vmem:[%s4027_s30 + $0x54] sm:$0xe] }
 0x112   : > { %v474_v0 = vsel %vm4095_vm5, %v469_v32, %v473_v22  ;;  %v862_v61 = vsel %vm4051_vm2, %v860_v27, %v861_v11  ;;  %v1259_v34 = vshll.u32 %v3396_v1, 16  ;;  %v1269_v12 = vshrl.u32 %v4986_v63, 16 }
 0x113   : > { %v4994_v28 = vpop.permute.xlu0 %2382  ;;  %v3550_v16 = vcombine.low %v464_v62, %v474_v0  ;;  %v3574_v21 = vcombine.low %v859_v57, %v862_v61  ;;  %v806_v26 = vsel %vm4051_vm2, %v804_v45, %v805_v58  ;;  %v1258_v43 = vrot.slane %v1256_v5, 4  ;;  %v5022_v58 = vld [vmem:[%s4027_s30 + $0x5c] sm:$0x1] }
 0x114   : > { %v3566_v23 = vcombine.low %v803_v41, %v806_v26  ;;  %v1261_v25 = vrot.slane %v1259_v34, 5  ;;  %v3590_v2 = vcombine.low %v3396_v1, %v4986_v63  ;;  %v1064_v11 = vshrl.u32 %v3380_v10, 16  ;;  %v3476_v26 = vld [vmem:[%s4027_s30 + $0xc0] sm:$0xf] }
 0x115   : > { %2212 = vrot.lane.b32.xlu0 %v3550_v16, %s3940_s7  ;;  %v1067_v13 = vshll.u32 %v3380_v10, 16  ;;  %v1077_v31 = vshrl.u32 %v5003_v15, 16  ;;  %v3582_v37 = vcombine.low %v3380_v10, %v5003_v15  ;;  %2308 = vrot.lane.b32.xlu1 %v3574_v21, %s3939_s6  ;;  %v3060_v6 = vsel %vm3038_vm12, %v3027_v54, %v4897_v14 }
 0x116   : > { %v3044_v24 = vsel %vm3038_vm12, %v3011_v59, %v4902_v30  ;;  %v1262_v38 = vor.u32 %v1261_v25, %v1258_v43  ;;  %v1265_v42 = vshll.u32 %v4986_v63, 16  ;;  %v1066_v7 = vrot.slane %v1064_v11, 4 }
 0x117   : > { %v5013_v33 = vpop.permute.xlu1 %2478  ;;  %v1069_v46 = vrot.slane %v1067_v13, 5  ;;  %v1271_v22 = vrot.slane %v1269_v12, 4  ;;  %v1275_v39 = vshll.u32 %v3414_v56, 16  ;;  %v1073_v9 = vshll.u32 %v5003_v15, 16  ;;  %v3841_v13 = vld [vmem:[%s4027_s30 + $0x84] sm:$0xf] }
 0x118   : > { %v5024_v44 = vpop.permute.xlu0 %2462  ;;  %v1263_v3 = vrot.slane %v1262_v38, 4  ;;  %v1267_v48 = vrot.slane %v1265_v42, 5  ;;  %v1079_v14 = vrot.slane %v1077_v31, 4  ;;  %v1083_v53 = vshll.u32 %v5022_v58, 16  ;;  %v3842_v31 = vld [vmem:[%s4027_s30 + $0x88] sm:$0xf] }
 0x119   : > { %2292 = vrot.lane.b32.xlu0 %v3566_v23, %s3939_s6  ;;  %v1277_v30 = vrot.slane %v1275_v39, 5  ;;  %v1070_v50 = vor.u32 %v1069_v46, %v1066_v7  ;;  %v3093_v52 = vsel %vm3071_vm13, %v3060_v6, %v4916_v51  ;;  %2404 = vrot.lane.b32.xlu1 %v3590_v2, %s3937_s4  ;;  %v1075_v54 = vrot.slane %v1073_v9, 5  ;;  %v5064_v2 = vld [vmem:[%s4027_s30 + $0xc4] sm:$0xf]  ;;  %v3460_v42 = vld [vmem:[%s4027_s30 + $0x60] sm:$0xf] }
 0x11a   : > { %v1268_v55 = vsel %vm4095_vm5, %v1263_v3, %v1267_v48  ;;  %v1272_v40 = vor.u32 %v1271_v22, %v1267_v48  ;;  %v3077_v1 = vsel %vm3071_vm13, %v3044_v24, %v4929_v36  ;;  %3701 = vmatprep.subr.msk.bf16.mxu0 %vm3111_vm14, %v3093_v52  ;;  %v1085_v57 = vrot.slane %v1083_v53, 5  ;;  %v3843_v6 = vld [vmem:[%s4027_s30 + $0x24] sm:$0xf]  ;;  %v3844_v24 = vld [vmem:[%s4027_s30 + $0x28] sm:$0xf] }
 0x11b   : > { %v5033_v35 = vpop.permute.xlu1 %2558  ;;  %v1071_v32 = vrot.slane %v1070_v50, 4  ;;  %v3446_v51 = vrot.slane %v3430_v47, 9  ;;  %v1467_v27 = vrot.slane %v4986_v63, 5  ;;  %v1080_v41 = vor.u32 %v1079_v14, %v1075_v54  ;;  %v3461_v39 = vld [vmem:[%s4027_s30 + $0x64] sm:$0xf] }
 0x11c   : > { %v5041_v8 = vpop.permute.xlu0 %2542  ;;  %v1273_v62 = vrot.slane %v1272_v40, 4  ;;  %v1470_v45 = vrot.slane %v3414_v56, 5  ;;  %v3438_v59 = vrot.slane %v3422_v20, 9  ;;  %v1411_v5 = vrot.slane %v5003_v15, 5  ;;  %v3494_v20 = vld [vmem:[%s4027_s30 + $0xc8] sm:$0x1] }
 0x11d   : > { %2388 = vrot.lane.b32.xlu0 %v3582_v37, %s3937_s4  ;;  %v1076_v0 = vsel %vm4095_vm5, %v1071_v32, %v1075_v54  ;;  %v1468_v36 = vsel %vm4051_vm2, %v3446_v51, %v1467_v27  ;;  %v1469_v61 = vrot.slane %v1467_v27, 4  ;;  %v1081_v10 = vrot.slane %v1080_v41, 4 }
 0x11e   : > { %v1278_v63 = vsel %vm4095_vm5, %v1273_v62, %v1277_v30  ;;  %v1414_v16 = vrot.slane %v5022_v58, 5  ;;  %v3119_v21 = vsel %vm3111_vm14, %v3077_v1, 0  ;;  %v1412_v43 = vsel %vm4051_vm2, %v3438_v59, %v1411_v5  ;;  %v3486_v1 = vld [vmem:[%s4027_s30 + $0x68] sm:$0x1] }
 0x11f   : > { %v5050_v34 = vpop.permute.xlu1 %2654  ;;  %v3606_v23 = vcombine.low %v1268_v55, %v1278_v63  ;;  %v1471_v15 = vsel %vm4051_vm2, %v1469_v61, %v1470_v45  ;;  %v1413_v25 = vrot.slane %v1411_v5, 4  ;;  %3686 = vmatpush3.bf16.xpose.msra.mxu0 %v3119_v21  ;;  %v1086_v56 = vsel %vm4095_vm5, %v1081_v10, %v1085_v57  ;;  %v3510_v5 = vld [vmem:[%s4027_s30 + $0xc0] sm:$0xe] }
 0x120   : > { %v5057_v12 = vpop.permute.xlu0 %2638  ;;  %v3622_v11 = vcombine.low %v1468_v36, %v1471_v15  ;;  %v3539_v37 = vcombine.low %v3841_v13, %v3842_v31  ;;  %v3531_v38 = vcombine.low %v3843_v6, %v3844_v24  ;;  %v3598_v58 = vcombine.low %v1076_v0, %v1086_v56  ;;  %v3502_v21 = vld [vmem:[%s4027_s30 + $0x60] sm:$0xe] }
 0x121   : > { %2484 = vrot.lane.b32.xlu1 %v3606_v23, %s3941_s8  ;;  %v1415_v7 = vsel %vm4051_vm2, %v1413_v25, %v1414_v16  ;;  %v1865_v46 = vshrl.u32 %v3476_v26, 16  ;;  %v1868_v22 = vshll.u32 %v3476_v26, 16  ;;  %v1878_v14 = vshrl.u32 %v5064_v2, 16 }
 0x122   : > { %v3614_v3 = vcombine.low %v1412_v43, %v1415_v7  ;;  %v2860_v48 = vsel %vm2824_vm6, %v3539_v37, %v4953_v18  ;;  %v2836_v9 = vsel %vm2824_vm6, %v3531_v38, %v4957_v60  ;;  %2468 = vrot.lane.b32.xlu0 %v3598_v58, %s3941_s8  ;;  %v3638_v53 = vcombine.low %v3476_v26, %v5064_v2 }
 0x123   : > { %v5082_v47 = vpop.permute.xlu1 %2734  ;;  %v1867_v30 = vrot.slane %v1865_v46, 4  ;;  %v1870_v50 = vrot.slane %v1868_v22, 5  ;;  %v1673_v52 = vshrl.u32 %v3460_v42, 16  ;;  %v1676_v55 = vshll.u32 %v3460_v42, 16 }
 0x124   : > { %v1686_v40 = vshrl.u32 %v3461_v39, 16  ;;  %v3630_v54 = vcombine.low %v3460_v42, %v3461_v39  ;;  %v2897_v18 = vsel %vm2873_vm7, %v2860_v48, %v4964_v4  ;;  %v5090_v60 = vpop.permute.xlu0 %2718  ;;  %v2881_v57 = vsel %vm2873_vm7, %v2836_v9, %v4971_v49  ;;  %v5121_v48 = vld [vmem:[%s4027_s30 + $0xb4] sm:$0xf] }
 0x125   : > { %2564 = vrot.lane.b32.xlu1 %v3622_v11, %s3938_s5  ;;  %v1675_v32 = vrot.slane %v1673_v52, 4  ;;  %v1871_v51 = vor.u32 %v1870_v50, %v1867_v30  ;;  %v1874_v27 = vshll.u32 %v5064_v2, 16  ;;  %v1678_v62 = vrot.slane %v1676_v55, 5  ;;  %v5136_v52 = vld [vmem:[%s4027_s30 + $0x54] sm:$0xf] }
 0x126   : > { %v1880_v41 = vrot.slane %v1878_v14, 4  ;;  %v1884_v45 = vshll.u32 %v3494_v20, 16  ;;  %v1682_v59 = vshll.u32 %v3461_v39, 16  ;;  %2548 = vrot.lane.b32.xlu0 %v3614_v3, %s3938_s5  ;;  %v1688_v36 = vrot.slane %v1686_v40, 4 }
 0x127   : > { %v1872_v4 = vrot.slane %v1871_v51, 4  ;;  %v1876_v0 = vrot.slane %v1874_v27, 5  ;;  %v1692_v61 = vshll.u32 %v3486_v1, 16  ;;  %v1679_v10 = vor.u32 %v1678_v62, %v1675_v32  ;;  %v5101_v26 = vpop.permute.xlu1 %2814 }
 0x128   : > { %v1886_v63 = vrot.slane %v1884_v45, 5  ;;  %v1684_v16 = vrot.slane %v1682_v59, 5  ;;  %v2930_v49 = vsel %vm2906_vm8, %v2897_v18, %v4981_v29  ;;  %v2914_v25 = vsel %vm2906_vm8, %v2881_v57, %v4994_v28  ;;  %v5109_v29 = vpop.permute.xlu0 %2798 }
 0x129   : > { %2660 = vrot.lane.b32.xlu1 %v3638_v53, %s3942_s9  ;;  %v1877_v23 = vsel %vm4095_vm5, %v1872_v4, %v1876_v0  ;;  %v1881_v15 = vor.u32 %v1880_v41, %v1876_v0  ;;  %v1694_v43 = vrot.slane %v1692_v61, 5  ;;  %v1680_v56 = vrot.slane %v1679_v10, 4  ;;  %v5133_v53 = vld [vmem:[%s4027_s30 + $0xbc] sm:$0x1] }
 0x12a   : > { %v1689_v11 = vor.u32 %v1688_v36, %v1684_v16  ;;  %v3526_v13 = vrot.slane %v3510_v5, 9  ;;  %v2076_v31 = vrot.slane %v5064_v2, 5  ;;  %2644 = vrot.lane.b32.xlu0 %v3630_v54, %s3942_s9  ;;  %v2079_v6 = vrot.slane %v3494_v20, 5  ;;  %v5157_v41 = vld [vmem:[%s4027_s30 + $0x5c] sm:$0x1] }
 0x12b   : > { %v1882_v37 = vrot.slane %v1881_v15, 4  ;;  %v3518_v24 = vrot.slane %v3502_v21, 9  ;;  %v2020_v38 = vrot.slane %v3461_v39, 5  ;;  %v1685_v28 = vsel %vm4095_vm5, %v1680_v56, %v1684_v16  ;;  %v5124_v39 = vld [vmem:[%s4027_s30 + $0xb8] sm:$0xf] }
 0x12c   : > { %v1690_v42 = vrot.slane %v1689_v11, 4  ;;  %v2077_v58 = vsel %vm4051_vm2, %v3526_v13, %v2076_v31  ;;  %v2078_v7 = vrot.slane %v2076_v31, 4  ;;  %v2023_v3 = vrot.slane %v3486_v1, 5  ;;  %v5145_v1 = vld [vmem:[%s4027_s30 + $0x58] sm:$0xf] }
 0x12d   : > { %v1887_v2 = vsel %vm4095_vm5, %v1882_v37, %v1886_v63  ;;  %v2021_v46 = vsel %vm4051_vm2, %v3518_v24, %v2020_v38  ;;  %v2022_v22 = vrot.slane %v2020_v38, 4  ;;  %v2963_v50 = vsel %vm2939_vm9, %v2930_v49, %v5013_v33  ;;  %v706_v49 = vld [vmem:[%s4027_s30 + $0xb4] sm:$0xe] }
 0x12e   : > { %v3654_v9 = vcombine.low %v1877_v23, %v1887_v2  ;;  %v1695_v14 = vsel %vm4095_vm5, %v1690_v42, %v1694_v43  ;;  %v2080_v30 = vsel %vm4051_vm2, %v2078_v7, %v2079_v6  ;;  %v5138_v20 = vpop.permute.xlu1 %2224  ;;  %v2947_v18 = vsel %vm2939_vm9, %v2914_v25, %v5024_v44  ;;  %v698_v37 = vld [vmem:[%s4027_s30 + $0x54] sm:$0xe] }
 0x12f   : > { %v3646_v55 = vcombine.low %v1685_v28, %v1695_v14  ;;  %v3670_v40 = vcombine.low %v2077_v58, %v2080_v30  ;;  %v2024_v54 = vsel %vm4051_vm2, %v2022_v22, %v2023_v3  ;;  %v668_v32 = vshrl.u32 %v5121_v48, 16 }
 0x130   : > { %2740 = vrot.lane.b32.xlu1 %v3654_v9, %s3943_s10  ;;  %v3662_v33 = vcombine.low %v2021_v46, %v2024_v54  ;;  %v671_v57 = vshll.u32 %v5121_v48, 16  ;;  %v677_v51 = vshll.u32 %v5124_v39, 16  ;;  %v681_v62 = vshrl.u32 %v5124_v39, 16 }
 0x131   : > { %2724 = vrot.lane.b32.xlu0 %v3646_v55, %s3943_s10  ;;  %v687_v44 = vshll.u32 %v5133_v53, 16  ;;  %v476_v45 = vshrl.u32 %v5136_v52, 16  ;;  %v479_v59 = vshll.u32 %v5136_v52, 16  ;;  %v670_v4 = vrot.slane %v668_v32, 4  ;;  %v3398_v55 = vld [vmem:[%s4027_s30 + $0xc0] sm:$0xf] }
 0x132   : > { %v5151_v27 = vpop.permute.xlu0 %2208  ;;  %v673_v0 = vrot.slane %v671_v57, 5  ;;  %v679_v36 = vrot.slane %v677_v51, 5  ;;  %v485_v61 = vshll.u32 %v5145_v1, 16  ;;  %v683_v5 = vrot.slane %v681_v62, 4 }
 0x133   : > { %v689_v63 = vrot.slane %v687_v44, 5  ;;  %v478_v10 = vrot.slane %v476_v45, 4  ;;  %v481_v16 = vrot.slane %v479_v59, 5  ;;  %v489_v15 = vshrl.u32 %v5145_v1, 16  ;;  %v5166_v25 = vpop.permute.xlu1 %2304  ;;  %v3382_v45 = vld [vmem:[%s4027_s30 + $0x60] sm:$0xf] }
 0x134   : > { %2820 = vrot.lane.b32.xlu1 %v3670_v40, %s3944_s11  ;;  %v674_v21 = vor.u32 %v673_v0, %v670_v4  ;;  %v487_v23 = vrot.slane %v485_v61, 5  ;;  %v495_v43 = vshll.u32 %v5157_v41, 16  ;;  %v684_v56 = vor.u32 %v683_v5, %v679_v36 }
 0x135   : > { %2804 = vrot.lane.b32.xlu0 %v3662_v33, %s3944_s11  ;;  %v482_v11 = vor.u32 %v481_v16, %v478_v10  ;;  %v2996_v13 = vsel %vm2972_vm10, %v2963_v50, %v5033_v35  ;;  %v2980_v31 = vsel %vm2972_vm10, %v2947_v18, %v5041_v8  ;;  %v491_v38 = vrot.slane %v489_v15, 4  ;;  %v5191_v33 = vld [vmem:[%s4027_s30 + $0xc4] sm:$0xf] }
 0x136   : > { %v5174_v6 = vpop.permute.xlu0 %2288  ;;  %v675_v24 = vrot.slane %v674_v21, 4  ;;  %v497_v28 = vrot.slane %v495_v43, 5  ;;  %v3367_v42 = vrot.slane %v706_v49, 9  ;;  %v685_v58 = vrot.slane %v684_v56, 4 }
 0x137   : > { %v483_v7 = vrot.slane %v482_v11, 4  ;;  %v865_v2 = vrot.slane %v5124_v39, 5  ;;  %v868_v46 = vrot.slane %v5133_v53, 5  ;;  %v492_v22 = vor.u32 %v491_v38, %v487_v23  ;;  %v5193_v32 = vpop.permute.xlu1 %2400 }
 0x138   : > { %v680_v35 = vsel %vm4095_vm5, %v675_v24, %v679_v36  ;;  %v3359_v8 = vrot.slane %v698_v37, 9  ;;  %v809_v3 = vrot.slane %v5145_v1, 5  ;;  %v690_v9 = vsel %vm4095_vm5, %v685_v58, %v689_v63 }
 0x139   : > { %v488_v14 = vsel %vm4095_vm5, %v483_v7, %v487_v23  ;;  %v866_v30 = vsel %vm4051_vm2, %v3367_v42, %v865_v2  ;;  %v867_v50 = vrot.slane %v865_v2, 4  ;;  %v3559_v53 = vcombine.low %v680_v35, %v690_v9  ;;  %v3415_v23 = vld [vmem:[%s4027_s30 + $0xc8] sm:$0x1] }
 0x13a   : > { %v493_v40 = vrot.slane %v492_v22, 4  ;;  %v810_v54 = vsel %vm4051_vm2, %v3359_v8, %v809_v3  ;;  %v811_v18 = vrot.slane %v809_v3, 4  ;;  %v812_v51 = vrot.slane %v5157_v41, 5  ;;  %v5203_v59 = vpop.permute.xlu0 %2384  ;;  %v3383_v41 = vld [vmem:[%s4027_s30 + $0x64] sm:$0xf] }
 0x13b   : > { %v869_v57 = vsel %vm4051_vm2, %v867_v50, %v868_v46  ;;  %v3029_v62 = vsel %vm3005_vm11, %v2996_v13, %v5050_v34  ;;  %v3013_v44 = vsel %vm3005_vm11, %v2980_v31, %v5057_v12  ;;  %2230 = vrot.lane.b32.xlu1 %v3559_v53, %s3940_s7  ;;  %v1280_v36 = vshrl.u32 %v3398_v55, 16  ;;  %v3407_v13 = vld [vmem:[%s4027_s30 + $0x68] sm:$0x1]  ;;  %v3431_v3 = vld [vmem:[%s4027_s30 + $0xc0] sm:$0xe] }
 0x13c   : > { %v498_v4 = vsel %vm4095_vm5, %v493_v40, %v497_v28  ;;  %v3575_v0 = vcombine.low %v866_v30, %v869_v57  ;;  %v1283_v61 = vshll.u32 %v3398_v55, 16  ;;  %v813_v34 = vsel %vm4051_vm2, %v811_v18, %v812_v51  ;;  %v3423_v50 = vld [vmem:[%s4027_s30 + $0x60] sm:$0xe] }
 0x13d   : > { %v3551_v5 = vcombine.low %v488_v14, %v498_v4  ;;  %v1293_v12 = vshrl.u32 %v5191_v33, 16  ;;  %v3591_v63 = vcombine.low %v3398_v55, %v5191_v33  ;;  %v3567_v10 = vcombine.low %v810_v54, %v813_v34 }
 0x13e   : > { %v1282_v16 = vrot.slane %v1280_v36, 4  ;;  %v1285_v49 = vrot.slane %v1283_v61, 5  ;;  %v1088_v21 = vshrl.u32 %v3382_v45, 16  ;;  %v1091_v15 = vshll.u32 %v3382_v45, 16 }
 0x13f   : > { %2214 = vrot.lane.b32.xlu0 %v3551_v5, %s3940_s7  ;;  %v1101_v43 = vshrl.u32 %v3383_v41, 16  ;;  %v3583_v56 = vcombine.low %v3382_v45, %v3383_v41  ;;  %v3062_v11 = vsel %vm3038_vm12, %v3029_v62, %v5082_v47  ;;  %2310 = vrot.lane.b32.xlu1 %v3575_v0, %s3939_s6  ;;  %v3046_v37 = vsel %vm3038_vm12, %v3013_v44, %v5090_v60  ;;  %s3205_s7 = scalar_lea.sflag [#allocation3], %s230_s26 }
 0x140   : > { %v1090_v31 = vrot.slane %v1088_v21, 4  ;;  %v1286_v24 = vor.u32 %v1285_v49, %v1282_v16  ;;  %v1289_v38 = vshll.u32 %v5191_v33, 16  ;;  %v5222_v28 = vpop.permute.xlu1 %2480  ;;  %v1093_v42 = vrot.slane %v1091_v15, 5  ;;  %v5258_v15 = vld [vmem:[%s4027_s30 + $0xd0] sm:$0xf] }
 0x141   : > { %v1295_v58 = vrot.slane %v1293_v12, 4  ;;  %v1299_v7 = vshll.u32 %v3415_v23, 16  ;;  %v1097_v2 = vshll.u32 %v3383_v41, 16  ;;  %v5224_v46 = vpop.permute.xlu0 %2464  ;;  %v1103_v22 = vrot.slane %v1101_v43, 4  ;;  %v3462_v43 = vld [vmem:[%s4027_s30 + $0x6c] sm:$0xf] }
 0x142   : > { %v1287_v47 = vrot.slane %v1286_v24, 4  ;;  %v1291_v35 = vrot.slane %v1289_v38, 5  ;;  %v1107_v8 = vshll.u32 %v3407_v13, 16  ;;  %v1094_v9 = vor.u32 %v1093_v42, %v1090_v31  ;;  %v3845_v31 = vld [vmem:[%s4027_s30 + $0x90] sm:$0xf] }
 0x143   : > { %2294 = vrot.lane.b32.xlu0 %v3567_v10, %s3939_s6  ;;  %v1301_v60 = vrot.slane %v1299_v7, 5  ;;  %v1099_v14 = vrot.slane %v1097_v2, 5  ;;  %v3095_v30 = vsel %vm3071_vm13, %v3062_v11, %v5101_v26  ;;  %2406 = vrot.lane.b32.xlu1 %v3591_v63, %s3937_s4  ;;  %v3079_v54 = vsel %vm3071_vm13, %v3046_v37, %v5109_v29  ;;  %v3478_v10 = vld [vmem:[%s4027_s30 + $0xcc] sm:$0xf]  ;;  %v3846_v37 = vld [vmem:[%s4027_s30 + $0x94] sm:$0xf]  ;;  %s5431_s6 = scalar_lea.hbm %s5481_s3, %s3680_s28 }
 0x144   : > { %v1292_v55 = vsel %vm4095_vm5, %v1287_v47, %v1291_v35  ;;  %v1296_v53 = vor.u32 %v1295_v58, %v1291_v35  ;;  %v1109_v40 = vrot.slane %v1107_v8, 5  ;;  %3702 = vmatprep.subr.msk.bf16.mxu0 %vm3111_vm14, %v3095_v30  ;;  %v5237_v18 = vpop.permute.xlu1 %2560  ;;  %v1095_v57 = vrot.slane %v1094_v9, 4  ;;  %v3847_v58 = vld [vmem:[%s4027_s30 + $0x30] sm:$0xf]  ;;  %v3848_v7 = vld [vmem:[%s4027_s30 + $0x34] sm:$0xf] }
 0x145   : > { %v1104_v51 = vor.u32 %v1103_v22, %v1099_v14  ;;  %v3447_v62 = vrot.slane %v3431_v3, 9  ;;  %v1474_v26 = vrot.slane %v5191_v33, 5  ;;  %v5240_v44 = vpop.permute.xlu0 %2544  ;;  %v1477_v4 = vrot.slane %v3415_v23, 5  ;;  %v5273_v22 = vld [vmem:[%s4027_s30 + $0x70] sm:$0xf] }
 0x146   : > { %v1297_v45 = vrot.slane %v1296_v53, 4  ;;  %v3439_v0 = vrot.slane %v3423_v50, 9  ;;  %v1418_v36 = vrot.slane %v3383_v41, 5  ;;  %v1100_v29 = vsel %vm4095_vm5, %v1095_v57, %v1099_v14  ;;  %v3495_v53 = vld [vmem:[%s4027_s30 + $0xd4] sm:$0x1] }
 0x147   : > { %2390 = vrot.lane.b32.xlu0 %v3583_v56, %s3937_s4  ;;  %v1105_v61 = vrot.slane %v1104_v51, 4  ;;  %v1475_v5 = vsel %vm4051_vm2, %v3447_v62, %v1474_v26  ;;  %v1476_v34 = vrot.slane %v1474_v26, 4  ;;  %v1421_v63 = vrot.slane %v3407_v13, 5  ;;  %v3487_v62 = vld [vmem:[%s4027_s30 + $0x74] sm:$0x1] }
 0x148   : > { %v1302_v33 = vsel %vm4095_vm5, %v1297_v45, %v1301_v60  ;;  %v1419_v12 = vsel %vm4051_vm2, %v3439_v0, %v1418_v36  ;;  %v1420_v41 = vrot.slane %v1418_v36, 4  ;;  %v3121_v23 = vsel %vm3111_vm14, %v3079_v54, 0  ;;  %v5261_v56 = vpop.permute.xlu1 %2656 }
 0x149   : > { %v3607_v16 = vcombine.low %v1292_v55, %v1302_v33  ;;  %v1110_v49 = vsel %vm4095_vm5, %v1105_v61, %v1109_v40  ;;  %v1478_v21 = vsel %vm4051_vm2, %v1476_v34, %v1477_v4  ;;  %3688 = vmatpush3.bf16.xpose.msra.mxu0 %v3121_v23  ;;  %v3540_v24 = vcombine.low %v3845_v31, %v3846_v37  ;;  %v5267_v38 = vpop.permute.xlu0 %2640 }
 0x14a   : > { %v3599_v11 = vcombine.low %v1100_v29, %v1110_v49  ;;  %v1422_v13 = vsel %vm4051_vm2, %v1420_v41, %v1421_v63  ;;  %v3623_v42 = vcombine.low %v1475_v5, %v1478_v21  ;;  %v3532_v2 = vcombine.low %v3847_v58, %v3848_v7  ;;  %v3511_v63 = vld [vmem:[%s4027_s30 + $0xcc] sm:$0xe] }
 0x14b   : > { %2486 = vrot.lane.b32.xlu1 %v3607_v16, %s3941_s8  ;;  %v1889_v47 = vshrl.u32 %v3478_v10, 16  ;;  %v1892_v35 = vshll.u32 %v3478_v10, 16  ;;  %v3615_v8 = vcombine.low %v1419_v12, %v1422_v13  ;;  %v2863_v3 = vsel %vm2824_vm6, %v3540_v24, %v5138_v20  ;;  %v3503_v21 = vld [vmem:[%s4027_s30 + $0x6c] sm:$0xe] }
 0x14c   : > { %2470 = vrot.lane.b32.xlu0 %v3599_v11, %s3941_s8  ;;  %v1902_v60 = vshrl.u32 %v5258_v15, 16  ;;  %v1697_v9 = vshrl.u32 %v3462_v43, 16  ;;  %v3639_v50 = vcombine.low %v3478_v10, %v5258_v15  ;;  %v1700_v55 = vshll.u32 %v3462_v43, 16  ;;  %s3946_s8 = smov [#allocation2]  }
 0x14d   : > { %v1891_v14 = vrot.slane %v1889_v47, 4  ;;  %v1894_v30 = vrot.slane %v1892_v35, 5  ;;  %v2839_v40 = vsel %vm2824_vm6, %v3532_v2, %v5151_v27  ;;  %v1710_v57 = vshrl.u32 %v5273_v22, 16 }
 0x14e   : > { %v1699_v54 = vrot.slane %v1697_v9, 4  ;;  %v3631_v51 = vcombine.low %v3462_v43, %v5273_v22  ;;  %v1702_v20 = vrot.slane %v1700_v55, 5  ;;  %v2899_v26 = vsel %vm2873_vm7, %v2863_v3, %v5166_v25  ;;  %v2737_v0 = vpop.permute.xlu1 %2736 }
 0x14f   : > { %2566 = vrot.lane.b32.xlu1 %v3623_v42, %s3938_s5  ;;  %v1895_v45 = vor.u32 %v1894_v30, %v1891_v14  ;;  %v1898_v4 = vshll.u32 %v5258_v15, 16  ;;  %v1904_v27 = vrot.slane %v1902_v60, 4  ;;  %v1908_v36 = vshll.u32 %v3495_v53, 16 }
 0x150   : > { %2550 = vrot.lane.b32.xlu0 %v3615_v8, %s3938_s5  ;;  %v1706_v29 = vshll.u32 %v5273_v22, 16  ;;  %v1712_v61 = vrot.slane %v1710_v57, 4  ;;  %v2721_v5 = vpop.permute.xlu0 %2720  ;;  %v1703_v12 = vor.u32 %v1702_v20, %v1699_v54  ;;  %v1716_v41 = vshll.u32 %v3487_v62, 16 }
 0x151   : > { %v1896_v34 = vrot.slane %v1895_v45, 4  ;;  %v1900_v33 = vrot.slane %v1898_v4, 5  ;;  %v2883_v25 = vsel %vm2873_vm7, %v2839_v40, %v5174_v6  ;;  %v1910_v10 = vrot.slane %v1908_v36, 5 }
 0x152   : > { %v1708_v16 = vrot.slane %v1706_v29, 5  ;;  %v2932_v49 = vsel %vm2906_vm8, %v2899_v26, %v5193_v32  ;;  %v1704_v43 = vrot.slane %v1703_v12, 4  ;;  %v1718_v11 = vrot.slane %v1716_v41, 5  ;;  %v2817_v42 = vpop.permute.xlu1 %2816  ;;  %v5306_v32 = vld [vmem:[%s5479_s1] sm:$0xf] }
 0x153   : > { %2662 = vrot.lane.b32.xlu1 %v3639_v50, %s3942_s9  ;;  %v1905_v23 = vor.u32 %v1904_v27, %v1900_v33  ;;  %v2916_v13 = vsel %vm2906_vm8, %v2883_v25, %v5203_v59  ;;  %v3527_v37 = vrot.slane %v3511_v63, 9  ;;  %v2083_v6 = vrot.slane %v5258_v15, 5  ;;  %3697 = vmatprep.mubr.msk.bf16.mxu0 %vm3111_vm14, %v5306_v32  ;;  %v3849_v25 = vld [vmem:[%s4027_s30 + $0x9c] sm:$0xf] }
 0x154   : > { %2646 = vrot.lane.b32.xlu0 %v3631_v51, %s3942_s9  ;;  %v1713_v31 = vor.u32 %v1712_v61, %v1708_v16  ;;  %v2086_v24 = vrot.slane %v3495_v53, 5  ;;  %v1901_v58 = vsel %vm4095_vm5, %v1896_v34, %v1900_v33  ;;  %v3519_v2 = vrot.slane %v3503_v21, 9  ;;  %v2801_v3 = vpop.permute.xlu0 %2800  ;;  %v3105_v61 = vld [vmem:[%s5480_s2] sm:$0xff]  ;;  %v3851_v21 = vld [vmem:[%s4027_s30 + $0x3c] sm:$0xf]  ;;  %s3861_s9 = sshll.u32 %s3946_s8, 4  ;;  %s3862_s9 = int_to_ptr.vmem [resolvable:$false] %s3861_s9 }
 0x155   : > { %v1906_v7 = vrot.slane %v1905_v23, 4  ;;  %v2027_v59 = vrot.slane %v5273_v22, 5  ;;  %v1709_v15 = vsel %vm4095_vm5, %v1704_v43, %v1708_v16  ;;  %v2085_v35 = vrot.slane %v2083_v6, 4  ;;  %v3852_v23 = vld [vmem:[%s4027_s30 + $0x40] sm:$0xf] }
 0x156   : > { %v1714_v47 = vrot.slane %v1713_v31, 4  ;;  %v2030_v8 = vrot.slane %v3487_v62, 5  ;;  %v2084_v9 = vsel %vm4051_vm2, %v3527_v37, %v2083_v6  ;;  %v2965_v53 = vsel %vm2939_vm9, %v2932_v49, %v5222_v28 }
 0x157   : > { %v1911_v60 = vsel %vm4095_vm5, %v1906_v7, %v1910_v10  ;;  %v2028_v14 = vsel %vm4051_vm2, %v3519_v2, %v2027_v59  ;;  %v2029_v22 = vrot.slane %v2027_v59, 4  ;;  %v2087_v55 = vsel %vm4051_vm2, %v2085_v35, %v2086_v24  ;;  %v3850_v10 = vld [vmem:[%s4027_s30 + $0xa0] sm:$0xf] }
 0x158   : > { %v3655_v30 = vcombine.low %v1901_v58, %v1911_v60  ;;  %v1719_v50 = vsel %vm4095_vm5, %v1714_v47, %v1718_v11  ;;  %v2949_v57 = vsel %vm2939_vm9, %v2916_v13, %v5224_v46  ;;  %v2998_v51 = vsel %vm2972_vm10, %v2965_v53, %v5237_v18 }
 0x159   : > { %v3647_v40 = vcombine.low %v1709_v15, %v1719_v50  ;;  %v2031_v54 = vsel %vm4051_vm2, %v2029_v22, %v2030_v8  ;;  %v3671_v19 = vcombine.low %v2084_v9, %v2087_v55  ;;  %v2982_v62 = vsel %vm2972_vm10, %v2949_v57, %v5240_v44 }
 0x15a   : > { %2742 = vrot.lane.b32.xlu1 %v3655_v30, %s3943_s10  ;;  %v3031_v20 = vsel %vm3005_vm11, %v2998_v51, %v5261_v56  ;;  %v2227_v28 = vpop.permute.xlu1 %2226  ;;  %v3663_v17 = vcombine.low %v2028_v14, %v2031_v54  ;;  %v3015_v26 = vsel %vm3005_vm11, %v2982_v62, %v5267_v38  ;;  %v3543_v44 = vcombine.low %v5121_v48, %v5124_v39 }
 0x15b   : > { %2726 = vrot.lane.b32.xlu0 %v3647_v40, %s3943_s10  ;;  %v3064_v46 = vsel %vm3038_vm12, %v3031_v20, %v2737_v0  ;;  %v3048_v18 = vsel %vm3038_vm12, %v3015_v26, %v2721_v5  ;;  %v3535_v56 = vcombine.low %v5136_v52, %v5145_v1  ;;  %v3945_v29 = vmov 0   ;;  %v3854_v26 = vld [vmem:[%s4027_s30 + $0xac] sm:$0xf]  ;;  %s3863_s10 = scalar_lea.vmem %s3862_s9, 512 }
 0x15c   : > { %v3097_v45 = vsel %vm3071_vm13, %v3064_v46, %v2817_v42  ;;  %v2211_v4 = vpop.permute.xlu0 %2210  ;;  %v3081_v27 = vsel %vm3071_vm13, %v3048_v18, %v2801_v3  ;;  %3772 = vset.pattern.permute.xlu0 %v3945_v29  ;;  %v3541_v16 = vcombine.low %v3849_v25, %v3850_v10  ;;  %v3533_v43 = vcombine.low %v3851_v21, %v3852_v23 }
 0x15d   : > { %3703 = vmatprep.subr.msk.bf16.mxu0 %vm3111_vm14, %v3097_v45  ;;  %v3123_v38 = vsel %vm3111_vm14, %v3081_v27, 0  ;;  %v3855_v45 = vld [vmem:[%s4027_s30 + $0x48] sm:$0xf] }
 0x15e   : > { %2822 = vrot.lane.b32.xlu1 %v3671_v19, %s3944_s11  ;;  %v2307_v0 = vpop.permute.xlu1 %2306  ;;  %3690 = vmatpush3.bf16.xpose.msra.mxu0 %v3123_v38  ;;  %v2866_v13 = vsel %vm2824_vm6, %v3541_v16, %v2227_v28  ;;  %v2842_v31 = vsel %vm2824_vm6, %v3533_v43, %v2211_v4  ;;  %v3856_v4 = vld [vmem:[%s4027_s30 + $0x4c] sm:$0xf] }
 0x15f   : > { %2806 = vrot.lane.b32.xlu0 %v3663_v17, %s3944_s11  ;;  %v2901_v37 = vsel %vm2873_vm7, %v2866_v13, %v2307_v0  ;;  %v3853_v17 = vld [vmem:[%s4027_s30 + $0xa8] sm:$0xf]  ;;  %v3534_v27 = vcombine.low %v3855_v45, %v3856_v4  ;;  %s3223_s30 = sshll.u32 %s232_s29, 4  ;;  %s5433_s30 = int_to_ptr.vmem [resolvable:$true] %s3223_s30 }
 0x160   : > { %v2291_v36 = vpop.permute.xlu0 %2290  ;;  %v3542_v46 = vcombine.low %v3853_v17, %v3854_v26  ;;  %s3857_s15 = scalar_lea.vmem %s5433_s30, 256  ;;  %p3864_p1 = scmp.lt.s32.totalorder %s5433_s30, %s3862_s9 }
 0x161   : > { %v2885_v6 = vsel %vm2873_vm7, %v2842_v31, %v2291_v36  ;;  %p3858_p12 = scmp.ne.s32.totalorder %s5433_s30, %s3857_s15  ;;  %p3865_p2 = scmp.lt.s32.totalorder %s3863_s10, %s3857_s15 }
 0x162   : > { %v2403_v5 = vpop.permute.xlu1 %2402 }
 0x163   : > { %3108 = vperm.xlu0 %3772, %v3105_v61   ;;  %v2934_v24 = vsel %vm2906_vm8, %v2901_v37, %v2403_v5  ;;  %p3859_p13 = pnand %p3858_p12, %p4007_p4  ;;  %p3866_p3 = por %p3865_p2, %p3864_p1 }
 0x164   : > { %v2387_v34 = vpop.permute.xlu0 %2386 }
 0x165   : > { %v2918_v58 = vsel %vm2906_vm8, %v2885_v6, %v2387_v34  ;;  %p3860_p0 = pneg %p3859_p13 }
 0x167   : > { %p3867_p5 = pnand %p3866_p3, %p3860_p0 }
 0x169   : > { %v2483_v33 = vpop.permute.xlu1 %2482 }
 0x16a   : > { %v2967_v7 = vsel %vm2939_vm9, %v2934_v24, %v2483_v33 }
 0x16b   : > { %v2467_v12 = vpop.permute.xlu0 %2466 }
 0x16c   : > { %v2951_v59 = vsel %vm2939_vm9, %v2918_v58, %v2467_v12 }
 0x16d   : > { %v2563_v41 = vpop.permute.xlu1 %2562 }
 0x16e   : > { %v3000_v15 = vsel %vm2972_vm10, %v2967_v7, %v2563_v41 }
 0x16f   : > { %v2547_v63 = vpop.permute.xlu0 %2546 }
 0x170   : > { %v2984_v47 = vsel %vm2972_vm10, %v2951_v59, %v2547_v63 }
 0x171   : > { %v2659_v49 = vpop.permute.xlu1 %2658 }
 0x172   : > { %v3033_v35 = vsel %vm3005_vm11, %v3000_v15, %v2659_v49 }
 0x173   : > { %v2643_v11 = vpop.permute.xlu0 %2642 }
 0x174   : > { %v3017_v8 = vsel %vm3005_vm11, %v2984_v47, %v2643_v11 }
 0x178   : > { %v2739_v42 = vpop.permute.xlu1 %2738 }
 0x179   : > { %v3066_v3 = vsel %vm3038_vm12, %v3033_v35, %v2739_v42 }
 0x17a   : > { %v2723_v2 = vpop.permute.xlu0 %2722 }
 0x17b   : > { %v3050_v9 = vsel %vm3038_vm12, %v3017_v8, %v2723_v2 }
 0x17c   : > { %v2819_v60 = vpop.permute.xlu1 %2818 }
 0x17d   : > { %v3099_v14 = vsel %vm3071_vm13, %v3066_v3, %v2819_v60 }
 0x17e   : > { %v2803_v22 = vpop.permute.xlu0 %2802  ;;  %3704 = vmatprep.subr.msk.bf16.mxu0 %vm3111_vm14, %v3099_v14 }
 0x17f   : > { %v3083_v30 = vsel %vm3071_vm13, %v3050_v9, %v2803_v22 }
 0x180   : > { %v3125_v50 = vsel %vm3111_vm14, %v3083_v30, 0 }
 0x181   : > { %3692 = vmatpush3.bf16.xpose.msra.mxu0 %v3125_v50 }
 0x183   : > { %v2229_v55 = vpop.permute.xlu1 %2228 }
 0x184   : > { %v2869_v0 = vsel %vm2824_vm6, %v3542_v46, %v2229_v55 }
 0x187   : > { %v2213_v53 = vpop.permute.xlu0 %2212  ;;  %v2309_v40 = vpop.permute.xlu1 %2308 }
 0x188   : > { %v2845_v36 = vsel %vm2824_vm6, %v3534_v27, %v2213_v53  ;;  %v2903_v29 = vsel %vm2873_vm7, %v2869_v0, %v2309_v40 }
 0x18b   : > { %v2293_v54 = vpop.permute.xlu0 %2292  ;;  %v2405_v57 = vpop.permute.xlu1 %2404 }
 0x18c   : > { %v2887_v61 = vsel %vm2873_vm7, %v2845_v36, %v2293_v54  ;;  %v2936_v5 = vsel %vm2906_vm8, %v2903_v29, %v2405_v57 }
 0x18f   : > { %v2389_v51 = vpop.permute.xlu0 %2388 }
 0x190   : > { %v2920_v33 = vsel %vm2906_vm8, %v2887_v61, %v2389_v51 }
 0x193   : > { %v2485_v19 = vpop.permute.xlu1 %2484 }
 0x194   : > { %v2469_v62 = vpop.permute.xlu0 %2468  ;;  %v2969_v12 = vsel %vm2939_vm9, %v2936_v5, %v2485_v19 }
 0x195   : > { %v2953_v63 = vsel %vm2939_vm9, %v2920_v33, %v2469_v62 }
 0x197   : > { %v2565_v20 = vpop.permute.xlu1 %2564 }
 0x198   : > { %v2549_v28 = vpop.permute.xlu0 %2548  ;;  %v3002_v25 = vsel %vm2972_vm10, %v2969_v12, %v2565_v20 }
 0x199   : > { %v2986_v10 = vsel %vm2972_vm10, %v2953_v63, %v2549_v28 }
 0x19b   : > { %v2661_v18 = vpop.permute.xlu1 %2660 }
 0x19c   : > { %v2645_v38 = vpop.permute.xlu0 %2644  ;;  %v3035_v16 = vsel %vm3005_vm11, %v3002_v25, %v2661_v18 }
 0x19d   : > { %v3019_v49 = vsel %vm3005_vm11, %v2986_v10, %v2645_v38 }
 0x1a2   : > { %v2741_v34 = vpop.permute.xlu1 %2740 }
 0x1a3   : > { %v2725_v41 = vpop.permute.xlu0 %2724  ;;  %v3068_v21 = vsel %vm3038_vm12, %v3035_v16, %v2741_v34 }
 0x1a4   : > { %v3052_v43 = vsel %vm3038_vm12, %v3019_v49, %v2725_v41 }
 0x1a6   : > { %v2821_v23 = vpop.permute.xlu1 %2820 }
 0x1a7   : > { %v3101_v11 = vsel %vm3071_vm13, %v3068_v21, %v2821_v23  ;;  %v2805_v13 = vpop.permute.xlu0 %2804 }
 0x1a8   : > { %v3085_v31 = vsel %vm3071_vm13, %v3052_v43, %v2805_v13  ;;  %3705 = vmatprep.subr.msk.bf16.mxu0 %vm3111_vm14, %v3101_v11 }
 0x1a9   : > { %v3127_v37 = vsel %vm3111_vm14, %v3085_v31, 0 }
 0x1aa   : > { %3694 = vmatpush3.bf16.xpose.msra.mxu0 %v3127_v37 }
 0x1ad   : > { %v2231_v6 = vpop.permute.xlu1 %2230 }
 0x1ae   : > { %v2872_v60 = vsel %vm2824_vm6, %v3543_v44, %v2231_v6 }
 0x1b1   : > { %v2215_v24 = vpop.permute.xlu0 %2214  ;;  %v2311_v42 = vpop.permute.xlu1 %2310 }
 0x1b2   : > { %v2848_v9 = vsel %vm2824_vm6, %v3535_v56, %v2215_v24  ;;  %v2905_v14 = vsel %vm2873_vm7, %v2872_v60, %v2311_v42 }
 0x1b5   : > { %v2295_v58 = vpop.permute.xlu0 %2294  ;;  %v2407_v7 = vpop.permute.xlu1 %2406 }
 0x1b6   : > { %v2889_v22 = vsel %vm2873_vm7, %v2848_v9, %v2295_v58  ;;  %v2938_v30 = vsel %vm2906_vm8, %v2905_v14, %v2407_v7 }
 0x1b9   : > { %v2391_v2 = vpop.permute.xlu0 %2390 }
 0x1ba   : > { %v2922_v55 = vsel %vm2906_vm8, %v2889_v22, %v2391_v2 }
 0x1bd   : > { %v2487_v59 = vpop.permute.xlu1 %2486 }
 0x1be   : > { %v2471_v15 = vpop.permute.xlu0 %2470  ;;  %v2971_v53 = vsel %vm2939_vm9, %v2938_v30, %v2487_v59 }
 0x1bf   : > { %v2955_v48 = vsel %vm2939_vm9, %v2922_v55, %v2471_v15 }
 0x1c1   : > { %v2567_v47 = vpop.permute.xlu1 %2566 }
 0x1c2   : > { %v2551_v35 = vpop.permute.xlu0 %2550  ;;  %v3004_v39 = vsel %vm2972_vm10, %v2971_v53, %v2567_v47 }
 0x1c3   : > { %v2988_v52 = vsel %vm2972_vm10, %v2955_v48, %v2551_v35 }
 0x1c5   : > { %v2663_v8 = vpop.permute.xlu1 %2662 }
 0x1c6   : > { %v2647_v3 = vpop.permute.xlu0 %2646  ;;  %v3037_v1 = vsel %vm3005_vm11, %v3004_v39, %v2663_v8 }
 0x1c7   : > { %v3021_v44 = vsel %vm3005_vm11, %v2988_v52, %v2647_v3 }
 0x1cc   : > { %v2743_v50 = vpop.permute.xlu1 %2742 }
 0x1cd   : > { %v2727_v40 = vpop.permute.xlu0 %2726  ;;  %v3070_v56 = vsel %vm3038_vm12, %v3037_v1, %v2743_v50 }
 0x1ce   : > { %v3054_v57 = vsel %vm3038_vm12, %v3021_v44, %v2727_v40 }
 0x1d0   : > { %v2823_v54 = vpop.permute.xlu1 %2822 }
 0x1d1   : > { %v3103_v51 = vsel %vm3071_vm13, %v3070_v56, %v2823_v54  ;;  %v2807_v19 = vpop.permute.xlu0 %2806 }
 0x1d2   : > { %v3087_v62 = vsel %vm3071_vm13, %v3054_v57, %v2807_v19  ;;  %3706 = vmatprep.subr.msk.bf16.mxu0 %vm3111_vm14, %v3103_v51 }
 0x1d3   : > { %v3129_v20 = vsel %vm3111_vm14, %v3087_v62, 0 }
 0x1d4   : > { %3696 = vmatpush3.bf16.xpose.msra.mxu0 %v3129_v20 }
 0x1db   : > { %3698 = vmatmul.mubr.msk.bf16.vlgmr.msra.gmra.mrb[0].mxu0 %vm3111_vm14, %v5306_v32 }
 0x1e2   : > { %v3109_v28 = vpop.permute.xlu0 %3108 }
 0x2ae   : > { %v3181_v17 = vpop.f32.mrb[0].mxu0 }
 0x2af   : > { %v3182_v26 = vadd.f32 %v3181_v17, %v3109_v28  ;;  %v3183_v46 = vpop.f32.mrb[1].mxu0 }
 0x2b0   : > { %v3184_v18 = vadd.f32 %v3183_v46, %v3109_v28  ;;  %v3185_v45 = vpop.f32.mrb[2].mxu0 }
 0x2b1   : > { %v3673_v4 = vmul.f32 -1.442695, %v3182_v26  ;;  %v3186_v27 = vpop.f32.mrb[3].mxu0 }
 0x2b2   : > { %v3674_v38 = vmul.f32 -1.442695, %v3184_v18 }
 0x2b3   : > { %3821 = vpow2.f32 %v3673_v4 }
 0x2b4   : > { %3823 = vpow2.f32 %v3674_v38 }
 0x2bd   : > { %v3822_v0 = vpop.eup %3821 }
 0x2be   : > { %v3824_v36 = vpop.eup %3823  ;;  %v3194_v29 = vadd.f32 1.0, %v3822_v0 }
 0x2bf   : > { %v3195_v61 = vadd.f32 1.0, %v3824_v36 }
 0x2c0   : > { %3825 = vrcp.f32 %v3194_v29 }
 0x2c1   : > { %3827 = vrcp.f32 %v3195_v61 }
 0x2ca   : > { %v3826_v32 = vpop.eup %3825 }
 0x2cb   : > { %v3828_v5 = vpop.eup %3827  ;;  %v3200_v34 = vmul.f32 %v3826_v32, %v3182_v26 }
 0x2cc   : > { %v3201_v33 = vmul.f32 %v3828_v5, %v3184_v18 }
 0x2cd   : > { %3202 = vst [vmem:[%s232_s29] sm:$0xff] %v3200_v34 }
 0x2ce   : > { %3203 = vst [vmem:[%s232_s29 + $0x8] sm:$0xff] %v3201_v33 }
 0x2cf   : > { %3870 = shalt.err (!%p3867_p5)
}
 0x2d0   : > { %s3871_s11 = scalar_lea.hbm %s5431_s6, 256  ;;  %s3875_s21 = scalar_lea.hbm %s5481_s3, 512 }
 0x2d1   : > { %p3872_p6 = scmp.ne.s32.totalorder %s5431_s6, %s3871_s11  ;;  %p3876_p10 = scmp.lt.u32.totalorder %s5431_s6, %s5481_s3 }
 0x2d2   : > { %p3877_p11 = scmp.lt.u32.totalorder %s3875_s21, %s3871_s11  ;;  %p3879_p13 = scmp.lt.u32.totalorder %s3871_s11, %s5431_s6 }
 0x2d3   : > { %p3873_p7 = pnand %p3872_p6, %p4007_p4 }
 0x2d4   : > { %p3878_p12 = por %p3877_p11, %p3876_p10 }
 0x2d5   : > { %p3874_p9 = pneg %p3873_p7 }
 0x2d6   : > { %p3880_p0 = por %p3879_p13, %p3878_p12 }
 0x2d8   : > { %p3881_p1 = pnand %p3880_p0, %p3874_p9 }
 0x2da   : > { %3884 = shalt.err (!%p3881_p1)
}
 0x2db   : > { %3708 = dma.vmem_to_hbm [thread:$0]  (%p4007_p4), %s5433_s30, 256, %s5431_s6, %s3205_s7  }
 0x2dc PF: > { %p3714_p2 = scmp.ge.s32.totalorder %s3935_s17, 2  ;;  %s3235_s27 = sand.u32 1, %s3915_s12  }
 0x2dd   : > { %s3236_s28 = scalar_lea.sflag [#allocation3], %s3235_s27 }
 0x2de   : > { %p3711_p3 = pnand %p3714_p2, %p4014_p8 }
 0x2e0   : > { %3910 = dma.done.wait (!%p3711_p3), %s3236_s28, 256  }
 0x2e1   : > { %3912 = vsyncadd (!%p3711_p3), %s3236_s28, 4294967040  ;;  %s16_s17 = sadd.s32 1, %s3935_s17   ;;  %s5488_s12 = smov %s3919_s13 }
 0x2e2   : > { %p13_p5 = scmp.ge.s32.totalorder %s16_s17, 4   ;;  %s5489_s13 = smov %s3923_s14 }
 0x2e3   : > { %s5490_s14 = smov %s4020_s25  ;;  %s5491_s15 = smov %s3931_s16 }
 0x2e4   : > { %s5492_s16 = smov %s5494_s20  ;;  %15 = sbr.rel (!%p13_p5) target bundleno = 4 (0x4), region = 75 }
 0x2eb   :  { %3241 = vsyncpa [#allocation3], 1 }
 0x2ec   :  { %3243 = vsyncpa [#allocation3 + $0x1], 1 }

</bundles_post_ra>
